<compile_context>
chip_gen: v5e
topology: v5e:2x2
jax: 0.10.0
libtpu: 0.0.40
codegen_flags: <defaults>
</compile_context>

<pallas_src>
import functools

import numpy as np
import jax
import jax.numpy as jnp
from jax.experimental import pallas as pl
from jax.experimental.pallas import tpu as pltpu

EPS = 1e-5  # nn.LayerNorm default eps


def _pair(v):
    return (v, v) if isinstance(v, int) else tuple(v)


# ---------------------------------------------------------------------------
# Static 1-D bilinear (align_corners=True) interpolation matrices.
# ---------------------------------------------------------------------------
def _bilinear_matrix_1d(out_size, in_size):
    """(out_size, in_size) interpolation matrix, align_corners=True."""
    if out_size == 1:
        # TODO(synk): PyTorch's align_corners=True with output size 1 selects
        # input index 0; confirmed consistent with the JAX reference below.
        src = np.zeros((1,), np.float64)
    else:
        src = np.arange(out_size, dtype=np.float64) * ((in_size - 1) / (out_size - 1))
    i0 = np.clip(np.floor(src).astype(np.int64), 0, in_size - 1)
    i1 = np.minimum(i0 + 1, in_size - 1)
    frac = src - i0
    m = np.zeros((out_size, in_size), np.float64)
    m[np.arange(out_size), i0] += 1.0 - frac
    m[np.arange(out_size), i1] += frac
    return m


# ---------------------------------------------------------------------------
# Fused kernel:
#   ChannelNorm -> tanh -> separable bilinear resize -> per-sign gamma
#   -> 1x1 conv (+bias)
# ---------------------------------------------------------------------------
def _modblock_kernel(scales_ref, cw_ref, cb_ref,        # SMEM scalars
                     x_ref, nw_ref, nb_ref, mw_ref, mh_ref,  # VMEM inputs
                     o_ref):                              # VMEM output
    x = x_ref[...].astype(jnp.float32)                    # (B, C, H, W)
    b, c, h, w = x.shape
    th, h_in = mh_ref.shape                               # (TH, H)
    tw = mw_ref.shape[1]                                  # (W, TW) -> TW

    # --- ChannelNorm (LayerNorm over the channel axis) + affine + tanh ------
    # Channel axis is a *major* axis here -> the reduction is plain VPU adds.
    mean = jnp.mean(x, axis=1, keepdims=True)              # (B, 1, H, W)
    var = jnp.mean(jnp.square(x - mean), axis=1, keepdims=True)
    y = jnp.tanh((x - mean) * jax.lax.rsqrt(var + EPS)
                 * nw_ref[...] + nb_ref[...])              # (B, C, H, W)

    # --- Separable bilinear resize (align_corners=True) ---------------------
    # Width pass: one MXU matmul with M = B*C*H (batch folded into M).
    z = jnp.dot(y.reshape(b * c * h, w), mw_ref[...],
                precision=jax.lax.Precision.HIGHEST,
                preferred_element_type=jnp.float32)        # (B*C*H, TW)
    z = z.reshape(b * c, h, tw)
    # Height pass: batched matmul (B*C small slabs), contraction over H.
    mh_b = jnp.broadcast_to(mh_ref[...], (b * c, th, h_in))
    r = jnp.einsum("bth,bhs->bts", mh_b, z,
                   precision=jax.lax.Precision.HIGHEST,
                   preferred_element_type=jnp.float32)     # (B*C, TH, TW)

    # --- Per-sign gamma (pos branch is r >= 0, matching the PyTorch module) --
    neg = scales_ref[0]
    pos = scales_ref[1]
    r = r * jnp.where(r < 0, neg, pos)
    r = r.reshape(b, c, th, tw)

    # --- 1x1 conv (+bias): tiny K -> unrolled scalar*vector FMAs ------------
    # Weights/bias are SMEM scalars, so each term is a scalar-operand VPU FMA
    # (no sublane/lane broadcasts); the MXU stays free for the resize matmuls.
    cout = o_ref.shape[1]
    for o in range(cout):
        acc = cw_ref[o, 0] * r[:, 0]
        for ci in range(1, c):
            acc = acc + cw_ref[o, ci] * r[:, ci]
        o_ref[:, o, :, :] = (acc + cb_ref[o]).astype(o_ref.dtype)


# ---------------------------------------------------------------------------
# ModBlock: parameters + forward
# (defaults: block_order='norm-squash-resize', norm_type='ChannelNorm',
#  resize_type='UpsampleBilinear')
# ---------------------------------------------------------------------------
def init_modblock_params(key, in_channels, out_channels):
    k_w, k_b = jax.random.split(key)
    bound = 1.0 / (in_channels ** 0.5)  # Conv2d(kernel_size=1) default bound
    return {
        "norm_w": jnp.ones((in_channels,), jnp.float32),   # ChannelNorm affine
        "norm_b": jnp.zeros((in_channels,), jnp.float32),
        "neg_scale": jnp.float32(1.0),
        "pos_scale": jnp.float32(1.0),
        # 1x1 conv weight stored (C_out, C_in) (PyTorch layout, k=1 squeezed)
        "conv_w": jax.random.uniform(
            k_w, (out_channels, in_channels), jnp.float32, -bound, bound),
        "conv_b": jax.random.uniform(
            k_b, (out_channels,), jnp.float32, -bound, bound),
    }


def _choose_batch_tile(n, c, h, w, th, tw, cout):
    """Batch-group size per grid step.

    Goals: fold batch into the matmul M dim (M = bt*c*h), stay inside a
    conservative per-step VMEM budget (fits v5e's 16 MiB scoped default and
    v7x's 64 MiB physical), keep >= 2 grid steps when n >= 2 so both v7x
    TensorCores get work, and divide n exactly (no boundary blocks).
    """
    # Rough per-batch f32 working set (x, y, width pass, height pass, output),
    # including pipeline double-buffering of the HBM-streamed blocks.
    per_b = 4 * (3 * c * h * w + 2 * c * h * tw + 2 * c * th * tw
                 + 2 * cout * th * tw)
    budget = 8 << 20
    bt = max(1, min(n, budget // max(per_b, 1)))
    # Cap M = bt*c*h at a couple of MXU passes worth of rows.
    while bt > 1 and bt * c * h > 512:
        bt -= 1
    # Keep at least two grid steps for v7x's two TensorCores when possible.
    if n >= 2:
        bt = min(bt, max(1, n // 2))
    # Make it divide n.
    while n % bt:
        bt -= 1
    return max(1, bt)
    # TODO(synk): when n == 1 and the spatial output is huge, additionally
    # split TH across a second parallel grid axis so v7x's second TC has work.


@functools.partial(jax.jit, static_argnames=("target_size",))
def modblock_forward(params, x_nchw, target_size):
    """ModBlock forward (NCHW in, NCHW out):
    ChannelNorm -> tanh -> bilinear(align_corners) resize -> per-sign gamma
    -> 1x1 conv (+bias), all in a single fused Pallas kernel.
    """
    # TODO(synk): the 2-D input path (in_shape == 1 -> AddSpatialDimension),
    # AdaptiveFullstackNorm, non-bilinear resize modes and torch memory_format
    # plumbing are not implemented; only the default ChannelNorm +
    # UpsampleBilinear 'norm-squash-resize' path is covered.
    n, c, h, w = x_nchw.shape
    th, tw = _pair(target_size)
    cout = params["conv_w"].shape[0]

    # Separable resize operators (compile-time constants, a few KiB total).
    mw = jnp.asarray(_bilinear_matrix_1d(tw, w).T, jnp.float32)   # (W, TW)
    mh = jnp.asarray(_bilinear_matrix_1d(th, h), jnp.float32)     # (TH, H)

    scales = jnp.stack([params["neg_scale"], params["pos_scale"]]).astype(jnp.float32)

    bt = _choose_batch_tile(n, c, h, w, th, tw, cout)
    grid = (n // bt,)

    out = pl.pallas_call(
        _modblock_kernel,
        out_shape=jax.ShapeDtypeStruct((n, cout, th, tw), x_nchw.dtype),
        grid=grid,
        in_specs=[
            pl.BlockSpec(memory_space=pltpu.MemorySpace.SMEM),       # gamma scales (2,)
            pl.BlockSpec(memory_space=pltpu.MemorySpace.SMEM),       # conv weight (Cout, Cin)
            pl.BlockSpec(memory_space=pltpu.MemorySpace.SMEM),       # conv bias (Cout,)
            pl.BlockSpec((bt, c, h, w), lambda i: (i, 0, 0, 0)),     # x batch group
            pl.BlockSpec((1, c, 1, 1), lambda i: (0, 0, 0, 0)),      # norm weight
            pl.BlockSpec((1, c, 1, 1), lambda i: (0, 0, 0, 0)),      # norm bias
            pl.BlockSpec((w, tw), lambda i: (0, 0)),                 # width resize op
            pl.BlockSpec((th, h), lambda i: (0, 0)),                 # height resize op
        ],
        out_specs=pl.BlockSpec((bt, cout, th, tw), lambda i: (i, 0, 0, 0)),
        compiler_params=pltpu.CompilerParams(
            dimension_semantics=("parallel",),
            vmem_limit_bytes=32 * 1024 * 1024,
        ),
    )(scales,
      params["conv_w"].astype(jnp.float32),
      params["conv_b"].astype(jnp.float32),
      x_nchw,
      params["norm_w"].reshape(1, c, 1, 1).astype(jnp.float32),
      params["norm_b"].reshape(1, c, 1, 1).astype(jnp.float32),
      mw, mh)

    if isinstance(target_size, int) and target_size == 1:
        out = out.reshape(n, cout)
    return out


# ---------------------------------------------------------------------------
# Pure-JAX reference (independent gather-based bilinear, f32 conv)
# ---------------------------------------------------------------------------
def _bilinear_resize_nchw_ref(x, out_h, out_w):
    n, c, h, w = x.shape

    def coords(o, i):
        if o == 1:
            src = jnp.zeros((1,), jnp.float32)
        else:
            src = jnp.arange(o, dtype=jnp.float32) * ((i - 1) / (o - 1))
        i0 = jnp.clip(jnp.floor(src).astype(jnp.int32), 0, i - 1)
        i1 = jnp.clip(i0 + 1, 0, i - 1)
        return i0, i1, src - i0.astype(jnp.float32)

    h0, h1, fh = coords(out_h, h)
    w0, w1, fw = coords(out_w, w)
    xr = (x[:, :, h0, :] * (1.0 - fh)[None, None, :, None]
          + x[:, :, h1, :] * fh[None, None, :, None])
    return xr[:, :, :, w0] * (1.0 - fw) + xr[:, :, :, w1] * fw


def modblock_reference(params, x_nchw, target_size):
    n, c, h, w = x_nchw.shape
    th, tw = _pair(target_size)
    x = x_nchw.astype(jnp.float32)
    mean = jnp.mean(x, axis=1, keepdims=True)
    var = jnp.mean(jnp.square(x - mean), axis=1, keepdims=True)
    x = (x - mean) * jax.lax.rsqrt(var + EPS)
    x = x * params["norm_w"][None, :, None, None] + params["norm_b"][None, :, None, None]
    x = jnp.tanh(x)
    x = _bilinear_resize_nchw_ref(x, th, tw)
    x = x * jnp.where(x < 0, params["neg_scale"], params["pos_scale"])
    z = (jnp.einsum("nchw,oc->nohw", x, params["conv_w"], precision="highest")
         + params["conv_b"][None, :, None, None])
    if isinstance(target_size, int) and target_size == 1:
        z = z.reshape(n, -1)
    return z


if __name__ == "__main__":
    key = jax.random.PRNGKey(0)
    k_x, k_p, k_nw, k_nb = jax.random.split(key, 4)

    in_channels, out_channels = 4, 8
    x = jax.random.normal(k_x, (2, in_channels, 16, 16), jnp.float32)   # NCHW
    target_size = 32

    params = init_modblock_params(k_p, in_channels, out_channels)
    # Perturb the (PyTorch-default) affine / gamma params so every term of the
    # forward pass is exercised by the check.
    params["norm_w"] = params["norm_w"] + 0.3 * jax.random.normal(k_nw, (in_channels,), jnp.float32)
    params["norm_b"] = params["norm_b"] + 0.1 * jax.random.normal(k_nb, (in_channels,), jnp.float32)
    params["neg_scale"] = jnp.float32(0.7)
    params["pos_scale"] = jnp.float32(1.3)

    out = jax.block_until_ready(modblock_forward(params, x, target_size=target_size))
    ref = jax.block_until_ready(modblock_reference(params, x, target_size))

    assert out.shape == (2, out_channels, target_size, target_size), out.shape
    max_err = float(jnp.max(jnp.abs(out - ref)))
    assert max_err < 1e-4, f"max |err| = {max_err}"
    print("KERNEL_OK")
</pallas_src>

<mosaic_0001>
module attributes {stable_mosaic.version = 11 : i64} {
  func.func @_modblock_kernel(%arg0: i32, %arg1: memref<2xf32, #tpu.memory_space<smem>>, %arg2: memref<8x4xf32, #tpu.memory_space<smem>>, %arg3: memref<8xf32, #tpu.memory_space<smem>>, %arg4: memref<1x4x16x16xf32, #tpu.memory_space<vmem>>, %arg5: memref<1x4x1x1xf32, #tpu.memory_space<vmem>>, %arg6: memref<1x4x1x1xf32, #tpu.memory_space<vmem>>, %arg7: memref<16x32xf32, #tpu.memory_space<vmem>>, %arg8: memref<32x16xf32, #tpu.memory_space<vmem>>, %arg9: memref<1x8x32x32xf32, #tpu.memory_space<vmem>>) attributes {dimension_semantics = [#tpu.dimension_semantics<parallel>], iteration_bounds = array<i64: 2>, scalar_prefetch = 0 : i64, scratch_operands = 0 : i64, tpu.core_type = #tpu.core_type<tc>, window_params = [{transform_indices = @transform_0, window_bounds = array<i64: 2>}, {transform_indices = @transform_1, window_bounds = array<i64: 8, 4>}, {transform_indices = @transform_2, window_bounds = array<i64: 8>}, {transform_indices = @transform_3, window_bounds = array<i64: 1, 4, 16, 16>}, {pipeline_mode = #tpu.pipeline_mode<synchronous>, transform_indices = @transform_4, window_bounds = array<i64: 1, 4, 1, 1>}, {pipeline_mode = #tpu.pipeline_mode<synchronous>, transform_indices = @transform_5, window_bounds = array<i64: 1, 4, 1, 1>}, {pipeline_mode = #tpu.pipeline_mode<synchronous>, transform_indices = @transform_6, window_bounds = array<i64: 16, 32>}, {pipeline_mode = #tpu.pipeline_mode<synchronous>, transform_indices = @transform_7, window_bounds = array<i64: 32, 16>}, {transform_indices = @transform_8, window_bounds = array<i64: 1, 8, 32, 32>}]} {
    %c0 = arith.constant 0 : index
    %c0_0 = arith.constant 0 : index
    %c0_1 = arith.constant 0 : index
    %c0_2 = arith.constant 0 : index
    %0 = vector.load %arg4[%c0, %c0_0, %c0_1, %c0_2] : memref<1x4x16x16xf32, #tpu.memory_space<vmem>>, vector<1x4x16x16xf32>
    %cst = arith.constant dense<0.000000e+00> : vector<1x16x16xf32>
    %1 = vector.multi_reduction <add>, %0, %cst [1] : vector<1x4x16x16xf32> to vector<1x16x16xf32>
    %2 = vector.shape_cast %1 : vector<1x16x16xf32> to vector<1x1x16x16xf32>
    %cst_3 = arith.constant 4.000000e+00 : f32
    %3 = vector.broadcast %cst_3 : f32 to vector<1x1x16x16xf32>
    %4 = arith.divf %2, %3 : vector<1x1x16x16xf32>
    %5 = vector.broadcast %4 : vector<1x1x16x16xf32> to vector<1x4x16x16xf32>
    %6 = arith.subf %0, %5 : vector<1x4x16x16xf32>
    %7 = arith.mulf %6, %6 : vector<1x4x16x16xf32>
    %cst_4 = arith.constant dense<0.000000e+00> : vector<1x16x16xf32>
    %8 = vector.multi_reduction <add>, %7, %cst_4 [1] : vector<1x4x16x16xf32> to vector<1x16x16xf32>
    %9 = vector.shape_cast %8 : vector<1x16x16xf32> to vector<1x1x16x16xf32>
    %cst_5 = arith.constant 4.000000e+00 : f32
    %10 = vector.broadcast %cst_5 : f32 to vector<1x1x16x16xf32>
    %11 = arith.divf %9, %10 : vector<1x1x16x16xf32>
    %12 = vector.broadcast %4 : vector<1x1x16x16xf32> to vector<1x4x16x16xf32>
    %13 = arith.subf %0, %12 : vector<1x4x16x16xf32>
    %cst_6 = arith.constant 9.99999974E-6 : f32
    %14 = vector.broadcast %cst_6 : f32 to vector<1x1x16x16xf32>
    %15 = arith.addf %11, %14 : vector<1x1x16x16xf32>
    %16 = math.rsqrt %15 : vector<1x1x16x16xf32>
    %17 = vector.broadcast %16 : vector<1x1x16x16xf32> to vector<1x4x16x16xf32>
    %18 = arith.mulf %13, %17 : vector<1x4x16x16xf32>
    %c0_7 = arith.constant 0 : index
    %c0_8 = arith.constant 0 : index
    %c0_9 = arith.constant 0 : index
    %c0_10 = arith.constant 0 : index
    %19 = vector.load %arg5[%c0_7, %c0_8, %c0_9, %c0_10] : memref<1x4x1x1xf32, #tpu.memory_space<vmem>>, vector<1x4x1x1xf32>
    %20 = vector.broadcast %19 : vector<1x4x1x1xf32> to vector<1x4x16x16xf32>
    %21 = arith.mulf %18, %20 : vector<1x4x16x16xf32>
    %c0_11 = arith.constant 0 : index
    %c0_12 = arith.constant 0 : index
    %c0_13 = arith.constant 0 : index
    %c0_14 = arith.constant 0 : index
    %22 = vector.load %arg6[%c0_11, %c0_12, %c0_13, %c0_14] : memref<1x4x1x1xf32, #tpu.memory_space<vmem>>, vector<1x4x1x1xf32>
    %23 = vector.broadcast %22 : vector<1x4x1x1xf32> to vector<1x4x16x16xf32>
    %24 = arith.addf %21, %23 : vector<1x4x16x16xf32>
    %25 = math.tanh %24 : vector<1x4x16x16xf32>
    %26 = vector.shape_cast %25 : vector<1x4x16x16xf32> to vector<64x16xf32>
    %c0_15 = arith.constant 0 : index
    %c0_16 = arith.constant 0 : index
    %27 = vector.load %arg7[%c0_15, %c0_16] : memref<16x32xf32, #tpu.memory_space<vmem>>, vector<16x32xf32>
    %cst_17 = arith.constant dense<0.000000e+00> : vector<64x32xf32>
    %28 = tpu.matmul %26, %27, %cst_17 {dimension_numbers = #tpu.dot_dimension_numbers<[1], [0], [0], [1], [0, 0, 1, 1], [], []>, precision = #tpu.contract_precision<fp32>} : vector<64x16xf32>, vector<16x32xf32>, vector<64x32xf32> -> vector<64x32xf32>
    %29 = vector.shape_cast %28 : vector<64x32xf32> to vector<4x16x32xf32>
    %c0_18 = arith.constant 0 : index
    %c0_19 = arith.constant 0 : index
    %30 = vector.load %arg8[%c0_18, %c0_19] : memref<32x16xf32, #tpu.memory_space<vmem>>, vector<32x16xf32>
    %31 = vector.shape_cast %30 : vector<32x16xf32> to vector<1x32x16xf32>
    %32 = vector.broadcast %31 : vector<1x32x16xf32> to vector<4x32x16xf32>
    "tpu.trace_start"() <{level = 10 : i32, message = "bth,bhs->bts"}> : () -> ()
    %cst_20 = arith.constant dense<0.000000e+00> : vector<4x32x32xf32>
    %33 = tpu.matmul %32, %29, %cst_20 {dimension_numbers = #tpu.dot_dimension_numbers<[2], [1], [1], [2], [0, 0, 0, 1, 1, 2], [0], [0]>, precision = #tpu.contract_precision<fp32>} : vector<4x32x16xf32>, vector<4x16x32xf32>, vector<4x32x32xf32> -> vector<4x32x32xf32>
    "tpu.trace_stop"() : () -> ()
    %c0_21 = arith.constant 0 : index
    %34 = memref.load %arg1[%c0_21] : memref<2xf32, #tpu.memory_space<smem>>
    %c1 = arith.constant 1 : index
    %35 = memref.load %arg1[%c1] : memref<2xf32, #tpu.memory_space<smem>>
    %cst_22 = arith.constant 0.000000e+00 : f32
    %36 = vector.broadcast %cst_22 : f32 to vector<4x32x32xf32>
    %37 = arith.cmpf olt, %33, %36 : vector<4x32x32xf32>
    %38 = vector.broadcast %34 : f32 to vector<4x32x32xf32>
    %39 = vector.broadcast %35 : f32 to vector<4x32x32xf32>
    %40 = arith.select %37, %38, %39 : vector<4x32x32xi1>, vector<4x32x32xf32>
    %41 = arith.mulf %33, %40 : vector<4x32x32xf32>
    %42 = vector.shape_cast %41 : vector<4x32x32xf32> to vector<1x4x32x32xf32>
    %c0_23 = arith.constant 0 : index
    %c0_24 = arith.constant 0 : index
    %43 = memref.load %arg2[%c0_23, %c0_24] : memref<8x4xf32, #tpu.memory_space<smem>>
    %44 = vector.extract_strided_slice %42 {offsets = [0, 0, 0, 0], sizes = [1, 1, 32, 32], strides = [1, 1, 1, 1]} : vector<1x4x32x32xf32> to vector<1x1x32x32xf32>
    %45 = vector.shape_cast %44 : vector<1x1x32x32xf32> to vector<1x32x32xf32>
    %46 = vector.broadcast %43 : f32 to vector<1x32x32xf32>
    %47 = arith.mulf %46, %45 : vector<1x32x32xf32>
    %c0_25 = arith.constant 0 : index
    %c1_26 = arith.constant 1 : index
    %48 = memref.load %arg2[%c0_25, %c1_26] : memref<8x4xf32, #tpu.memory_space<smem>>
    %49 = vector.extract_strided_slice %42 {offsets = [0, 1, 0, 0], sizes = [1, 1, 32, 32], strides = [1, 1, 1, 1]} : vector<1x4x32x32xf32> to vector<1x1x32x32xf32>
    %50 = vector.shape_cast %49 : vector<1x1x32x32xf32> to vector<1x32x32xf32>
    %51 = vector.broadcast %48 : f32 to vector<1x32x32xf32>
    %52 = arith.mulf %51, %50 : vector<1x32x32xf32>
    %53 = arith.addf %47, %52 : vector<1x32x32xf32>
    %c0_27 = arith.constant 0 : index
    %c2 = arith.constant 2 : index
    %54 = memref.load %arg2[%c0_27, %c2] : memref<8x4xf32, #tpu.memory_space<smem>>
    %55 = vector.extract_strided_slice %42 {offsets = [0, 2, 0, 0], sizes = [1, 1, 32, 32], strides = [1, 1, 1, 1]} : vector<1x4x32x32xf32> to vector<1x1x32x32xf32>
    %56 = vector.shape_cast %55 : vector<1x1x32x32xf32> to vector<1x32x32xf32>
    %57 = vector.broadcast %54 : f32 to vector<1x32x32xf32>
    %58 = arith.mulf %57, %56 : vector<1x32x32xf32>
    %59 = arith.addf %53, %58 : vector<1x32x32xf32>
    %c0_28 = arith.constant 0 : index
    %c3 = arith.constant 3 : index
    %60 = memref.load %arg2[%c0_28, %c3] : memref<8x4xf32, #tpu.memory_space<smem>>
    %61 = vector.extract_strided_slice %42 {offsets = [0, 3, 0, 0], sizes = [1, 1, 32, 32], strides = [1, 1, 1, 1]} : vector<1x4x32x32xf32> to vector<1x1x32x32xf32>
    %62 = vector.shape_cast %61 : vector<1x1x32x32xf32> to vector<1x32x32xf32>
    %63 = vector.broadcast %60 : f32 to vector<1x32x32xf32>
    %64 = arith.mulf %63, %62 : vector<1x32x32xf32>
    %65 = arith.addf %59, %64 : vector<1x32x32xf32>
    %c0_29 = arith.constant 0 : index
    %66 = memref.load %arg3[%c0_29] : memref<8xf32, #tpu.memory_space<smem>>
    %67 = vector.broadcast %66 : f32 to vector<1x32x32xf32>
    %68 = arith.addf %65, %67 : vector<1x32x32xf32>
    %c0_30 = arith.constant 0 : index
    %c0_31 = arith.constant 0 : index
    %c0_32 = arith.constant 0 : index
    %c0_33 = arith.constant 0 : index
    %69 = vector.load %arg9[%c0_30, %c0_31, %c0_32, %c0_33] : memref<1x8x32x32xf32, #tpu.memory_space<vmem>>, vector<1x1x32x32xf32>
    %70 = vector.shape_cast %69 : vector<1x1x32x32xf32> to vector<1x32x32xf32>
    %71 = vector.shape_cast %68 : vector<1x32x32xf32> to vector<1x1x32x32xf32>
    tpu.vector_store %arg9[%c0_30, %c0_31, %c0_32, %c0_33], %71 {strides = array<i32>} : memref<1x8x32x32xf32, #tpu.memory_space<vmem>>, vector<1x1x32x32xf32>,
    %c1_34 = arith.constant 1 : index
    %c0_35 = arith.constant 0 : index
    %72 = memref.load %arg2[%c1_34, %c0_35] : memref<8x4xf32, #tpu.memory_space<smem>>
    %73 = vector.extract_strided_slice %42 {offsets = [0, 0, 0, 0], sizes = [1, 1, 32, 32], strides = [1, 1, 1, 1]} : vector<1x4x32x32xf32> to vector<1x1x32x32xf32>
    %74 = vector.shape_cast %73 : vector<1x1x32x32xf32> to vector<1x32x32xf32>
    %75 = vector.broadcast %72 : f32 to vector<1x32x32xf32>
    %76 = arith.mulf %75, %74 : vector<1x32x32xf32>
    %c1_36 = arith.constant 1 : index
    %c1_37 = arith.constant 1 : index
    %77 = memref.load %arg2[%c1_36, %c1_37] : memref<8x4xf32, #tpu.memory_space<smem>>
    %78 = vector.extract_strided_slice %42 {offsets = [0, 1, 0, 0], sizes = [1, 1, 32, 32], strides = [1, 1, 1, 1]} : vector<1x4x32x32xf32> to vector<1x1x32x32xf32>
    %79 = vector.shape_cast %78 : vector<1x1x32x32xf32> to vector<1x32x32xf32>
    %80 = vector.broadcast %77 : f32 to vector<1x32x32xf32>
    %81 = arith.mulf %80, %79 : vector<1x32x32xf32>
    %82 = arith.addf %76, %81 : vector<1x32x32xf32>
    %c1_38 = arith.constant 1 : index
    %c2_39 = arith.constant 2 : index
    %83 = memref.load %arg2[%c1_38, %c2_39] : memref<8x4xf32, #tpu.memory_space<smem>>
    %84 = vector.extract_strided_slice %42 {offsets = [0, 2, 0, 0], sizes = [1, 1, 32, 32], strides = [1, 1, 1, 1]} : vector<1x4x32x32xf32> to vector<1x1x32x32xf32>
    %85 = vector.shape_cast %84 : vector<1x1x32x32xf32> to vector<1x32x32xf32>
    %86 = vector.broadcast %83 : f32 to vector<1x32x32xf32>
    %87 = arith.mulf %86, %85 : vector<1x32x32xf32>
    %88 = arith.addf %82, %87 : vector<1x32x32xf32>
    %c1_40 = arith.constant 1 : index
    %c3_41 = arith.constant 3 : index
    %89 = memref.load %arg2[%c1_40, %c3_41] : memref<8x4xf32, #tpu.memory_space<smem>>
    %90 = vector.extract_strided_slice %42 {offsets = [0, 3, 0, 0], sizes = [1, 1, 32, 32], strides = [1, 1, 1, 1]} : vector<1x4x32x32xf32> to vector<1x1x32x32xf32>
    %91 = vector.shape_cast %90 : vector<1x1x32x32xf32> to vector<1x32x32xf32>
    %92 = vector.broadcast %89 : f32 to vector<1x32x32xf32>
    %93 = arith.mulf %92, %91 : vector<1x32x32xf32>
    %94 = arith.addf %88, %93 : vector<1x32x32xf32>
    %c1_42 = arith.constant 1 : index
    %95 = memref.load %arg3[%c1_42] : memref<8xf32, #tpu.memory_space<smem>>
    %96 = vector.broadcast %95 : f32 to vector<1x32x32xf32>
    %97 = arith.addf %94, %96 : vector<1x32x32xf32>
    %c0_43 = arith.constant 0 : index
    %c1_44 = arith.constant 1 : index
    %c0_45 = arith.constant 0 : index
    %c0_46 = arith.constant 0 : index
    %98 = vector.load %arg9[%c0_43, %c1_44, %c0_45, %c0_46] : memref<1x8x32x32xf32, #tpu.memory_space<vmem>>, vector<1x1x32x32xf32>
    %99 = vector.shape_cast %98 : vector<1x1x32x32xf32> to vector<1x32x32xf32>
    %100 = vector.shape_cast %97 : vector<1x32x32xf32> to vector<1x1x32x32xf32>
    tpu.vector_store %arg9[%c0_43, %c1_44, %c0_45, %c0_46], %100 {strides = array<i32>} : memref<1x8x32x32xf32, #tpu.memory_space<vmem>>, vector<1x1x32x32xf32>,
    %c2_47 = arith.constant 2 : index
    %c0_48 = arith.constant 0 : index
    %101 = memref.load %arg2[%c2_47, %c0_48] : memref<8x4xf32, #tpu.memory_space<smem>>
    %102 = vector.extract_strided_slice %42 {offsets = [0, 0, 0, 0], sizes = [1, 1, 32, 32], strides = [1, 1, 1, 1]} : vector<1x4x32x32xf32> to vector<1x1x32x32xf32>
    %103 = vector.shape_cast %102 : vector<1x1x32x32xf32> to vector<1x32x32xf32>
    %104 = vector.broadcast %101 : f32 to vector<1x32x32xf32>
    %105 = arith.mulf %104, %103 : vector<1x32x32xf32>
    %c2_49 = arith.constant 2 : index
    %c1_50 = arith.constant 1 : index
    %106 = memref.load %arg2[%c2_49, %c1_50] : memref<8x4xf32, #tpu.memory_space<smem>>
    %107 = vector.extract_strided_slice %42 {offsets = [0, 1, 0, 0], sizes = [1, 1, 32, 32], strides = [1, 1, 1, 1]} : vector<1x4x32x32xf32> to vector<1x1x32x32xf32>
    %108 = vector.shape_cast %107 : vector<1x1x32x32xf32> to vector<1x32x32xf32>
    %109 = vector.broadcast %106 : f32 to vector<1x32x32xf32>
    %110 = arith.mulf %109, %108 : vector<1x32x32xf32>
    %111 = arith.addf %105, %110 : vector<1x32x32xf32>
    %c2_51 = arith.constant 2 : index
    %c2_52 = arith.constant 2 : index
    %112 = memref.load %arg2[%c2_51, %c2_52] : memref<8x4xf32, #tpu.memory_space<smem>>
    %113 = vector.extract_strided_slice %42 {offsets = [0, 2, 0, 0], sizes = [1, 1, 32, 32], strides = [1, 1, 1, 1]} : vector<1x4x32x32xf32> to vector<1x1x32x32xf32>
    %114 = vector.shape_cast %113 : vector<1x1x32x32xf32> to vector<1x32x32xf32>
    %115 = vector.broadcast %112 : f32 to vector<1x32x32xf32>
    %116 = arith.mulf %115, %114 : vector<1x32x32xf32>
    %117 = arith.addf %111, %116 : vector<1x32x32xf32>
    %c2_53 = arith.constant 2 : index
    %c3_54 = arith.constant 3 : index
    %118 = memref.load %arg2[%c2_53, %c3_54] : memref<8x4xf32, #tpu.memory_space<smem>>
    %119 = vector.extract_strided_slice %42 {offsets = [0, 3, 0, 0], sizes = [1, 1, 32, 32], strides = [1, 1, 1, 1]} : vector<1x4x32x32xf32> to vector<1x1x32x32xf32>
    %120 = vector.shape_cast %119 : vector<1x1x32x32xf32> to vector<1x32x32xf32>
    %121 = vector.broadcast %118 : f32 to vector<1x32x32xf32>
    %122 = arith.mulf %121, %120 : vector<1x32x32xf32>
    %123 = arith.addf %117, %122 : vector<1x32x32xf32>
    %c2_55 = arith.constant 2 : index
    %124 = memref.load %arg3[%c2_55] : memref<8xf32, #tpu.memory_space<smem>>
    %125 = vector.broadcast %124 : f32 to vector<1x32x32xf32>
    %126 = arith.addf %123, %125 : vector<1x32x32xf32>
    %c0_56 = arith.constant 0 : index
    %c2_57 = arith.constant 2 : index
    %c0_58 = arith.constant 0 : index
    %c0_59 = arith.constant 0 : index
    %127 = vector.load %arg9[%c0_56, %c2_57, %c0_58, %c0_59] : memref<1x8x32x32xf32, #tpu.memory_space<vmem>>, vector<1x1x32x32xf32>
    %128 = vector.shape_cast %127 : vector<1x1x32x32xf32> to vector<1x32x32xf32>
    %129 = vector.shape_cast %126 : vector<1x32x32xf32> to vector<1x1x32x32xf32>
    tpu.vector_store %arg9[%c0_56, %c2_57, %c0_58, %c0_59], %129 {strides = array<i32>} : memref<1x8x32x32xf32, #tpu.memory_space<vmem>>, vector<1x1x32x32xf32>,
    %c3_60 = arith.constant 3 : index
    %c0_61 = arith.constant 0 : index
    %130 = memref.load %arg2[%c3_60, %c0_61] : memref<8x4xf32, #tpu.memory_space<smem>>
    %131 = vector.extract_strided_slice %42 {offsets = [0, 0, 0, 0], sizes = [1, 1, 32, 32], strides = [1, 1, 1, 1]} : vector<1x4x32x32xf32> to vector<1x1x32x32xf32>
    %132 = vector.shape_cast %131 : vector<1x1x32x32xf32> to vector<1x32x32xf32>
    %133 = vector.broadcast %130 : f32 to vector<1x32x32xf32>
    %134 = arith.mulf %133, %132 : vector<1x32x32xf32>
    %c3_62 = arith.constant 3 : index
    %c1_63 = arith.constant 1 : index
    %135 = memref.load %arg2[%c3_62, %c1_63] : memref<8x4xf32, #tpu.memory_space<smem>>
    %136 = vector.extract_strided_slice %42 {offsets = [0, 1, 0, 0], sizes = [1, 1, 32, 32], strides = [1, 1, 1, 1]} : vector<1x4x32x32xf32> to vector<1x1x32x32xf32>
    %137 = vector.shape_cast %136 : vector<1x1x32x32xf32> to vector<1x32x32xf32>
    %138 = vector.broadcast %135 : f32 to vector<1x32x32xf32>
    %139 = arith.mulf %138, %137 : vector<1x32x32xf32>
    %140 = arith.addf %134, %139 : vector<1x32x32xf32>
    %c3_64 = arith.constant 3 : index
    %c2_65 = arith.constant 2 : index
    %141 = memref.load %arg2[%c3_64, %c2_65] : memref<8x4xf32, #tpu.memory_space<smem>>
    %142 = vector.extract_strided_slice %42 {offsets = [0, 2, 0, 0], sizes = [1, 1, 32, 32], strides = [1, 1, 1, 1]} : vector<1x4x32x32xf32> to vector<1x1x32x32xf32>
    %143 = vector.shape_cast %142 : vector<1x1x32x32xf32> to vector<1x32x32xf32>
    %144 = vector.broadcast %141 : f32 to vector<1x32x32xf32>
    %145 = arith.mulf %144, %143 : vector<1x32x32xf32>
    %146 = arith.addf %140, %145 : vector<1x32x32xf32>
    %c3_66 = arith.constant 3 : index
    %c3_67 = arith.constant 3 : index
    %147 = memref.load %arg2[%c3_66, %c3_67] : memref<8x4xf32, #tpu.memory_space<smem>>
    %148 = vector.extract_strided_slice %42 {offsets = [0, 3, 0, 0], sizes = [1, 1, 32, 32], strides = [1, 1, 1, 1]} : vector<1x4x32x32xf32> to vector<1x1x32x32xf32>
    %149 = vector.shape_cast %148 : vector<1x1x32x32xf32> to vector<1x32x32xf32>
    %150 = vector.broadcast %147 : f32 to vector<1x32x32xf32>
    %151 = arith.mulf %150, %149 : vector<1x32x32xf32>
    %152 = arith.addf %146, %151 : vector<1x32x32xf32>
    %c3_68 = arith.constant 3 : index
    %153 = memref.load %arg3[%c3_68] : memref<8xf32, #tpu.memory_space<smem>>
    %154 = vector.broadcast %153 : f32 to vector<1x32x32xf32>
    %155 = arith.addf %152, %154 : vector<1x32x32xf32>
    %c0_69 = arith.constant 0 : index
    %c3_70 = arith.constant 3 : index
    %c0_71 = arith.constant 0 : index
    %c0_72 = arith.constant 0 : index
    %156 = vector.load %arg9[%c0_69, %c3_70, %c0_71, %c0_72] : memref<1x8x32x32xf32, #tpu.memory_space<vmem>>, vector<1x1x32x32xf32>
    %157 = vector.shape_cast %156 : vector<1x1x32x32xf32> to vector<1x32x32xf32>
    %158 = vector.shape_cast %155 : vector<1x32x32xf32> to vector<1x1x32x32xf32>
    tpu.vector_store %arg9[%c0_69, %c3_70, %c0_71, %c0_72], %158 {strides = array<i32>} : memref<1x8x32x32xf32, #tpu.memory_space<vmem>>, vector<1x1x32x32xf32>,
    %c4 = arith.constant 4 : index
    %c0_73 = arith.constant 0 : index
    %159 = memref.load %arg2[%c4, %c0_73] : memref<8x4xf32, #tpu.memory_space<smem>>
    %160 = vector.extract_strided_slice %42 {offsets = [0, 0, 0, 0], sizes = [1, 1, 32, 32], strides = [1, 1, 1, 1]} : vector<1x4x32x32xf32> to vector<1x1x32x32xf32>
    %161 = vector.shape_cast %160 : vector<1x1x32x32xf32> to vector<1x32x32xf32>
    %162 = vector.broadcast %159 : f32 to vector<1x32x32xf32>
    %163 = arith.mulf %162, %161 : vector<1x32x32xf32>
    %c4_74 = arith.constant 4 : index
    %c1_75 = arith.constant 1 : index
    %164 = memref.load %arg2[%c4_74, %c1_75] : memref<8x4xf32, #tpu.memory_space<smem>>
    %165 = vector.extract_strided_slice %42 {offsets = [0, 1, 0, 0], sizes = [1, 1, 32, 32], strides = [1, 1, 1, 1]} : vector<1x4x32x32xf32> to vector<1x1x32x32xf32>
    %166 = vector.shape_cast %165 : vector<1x1x32x32xf32> to vector<1x32x32xf32>
    %167 = vector.broadcast %164 : f32 to vector<1x32x32xf32>
    %168 = arith.mulf %167, %166 : vector<1x32x32xf32>
    %169 = arith.addf %163, %168 : vector<1x32x32xf32>
    %c4_76 = arith.constant 4 : index
    %c2_77 = arith.constant 2 : index
    %170 = memref.load %arg2[%c4_76, %c2_77] : memref<8x4xf32, #tpu.memory_space<smem>>
    %171 = vector.extract_strided_slice %42 {offsets = [0, 2, 0, 0], sizes = [1, 1, 32, 32], strides = [1, 1, 1, 1]} : vector<1x4x32x32xf32> to vector<1x1x32x32xf32>
    %172 = vector.shape_cast %171 : vector<1x1x32x32xf32> to vector<1x32x32xf32>
    %173 = vector.broadcast %170 : f32 to vector<1x32x32xf32>
    %174 = arith.mulf %173, %172 : vector<1x32x32xf32>
    %175 = arith.addf %169, %174 : vector<1x32x32xf32>
    %c4_78 = arith.constant 4 : index
    %c3_79 = arith.constant 3 : index
    %176 = memref.load %arg2[%c4_78, %c3_79] : memref<8x4xf32, #tpu.memory_space<smem>>
    %177 = vector.extract_strided_slice %42 {offsets = [0, 3, 0, 0], sizes = [1, 1, 32, 32], strides = [1, 1, 1, 1]} : vector<1x4x32x32xf32> to vector<1x1x32x32xf32>
    %178 = vector.shape_cast %177 : vector<1x1x32x32xf32> to vector<1x32x32xf32>
    %179 = vector.broadcast %176 : f32 to vector<1x32x32xf32>
    %180 = arith.mulf %179, %178 : vector<1x32x32xf32>
    %181 = arith.addf %175, %180 : vector<1x32x32xf32>
    %c4_80 = arith.constant 4 : index
    %182 = memref.load %arg3[%c4_80] : memref<8xf32, #tpu.memory_space<smem>>
    %183 = vector.broadcast %182 : f32 to vector<1x32x32xf32>
    %184 = arith.addf %181, %183 : vector<1x32x32xf32>
    %c0_81 = arith.constant 0 : index
    %c4_82 = arith.constant 4 : index
    %c0_83 = arith.constant 0 : index
    %c0_84 = arith.constant 0 : index
    %185 = vector.load %arg9[%c0_81, %c4_82, %c0_83, %c0_84] : memref<1x8x32x32xf32, #tpu.memory_space<vmem>>, vector<1x1x32x32xf32>
    %186 = vector.shape_cast %185 : vector<1x1x32x32xf32> to vector<1x32x32xf32>
    %187 = vector.shape_cast %184 : vector<1x32x32xf32> to vector<1x1x32x32xf32>
    tpu.vector_store %arg9[%c0_81, %c4_82, %c0_83, %c0_84], %187 {strides = array<i32>} : memref<1x8x32x32xf32, #tpu.memory_space<vmem>>, vector<1x1x32x32xf32>,
    %c5 = arith.constant 5 : index
    %c0_85 = arith.constant 0 : index
    %188 = memref.load %arg2[%c5, %c0_85] : memref<8x4xf32, #tpu.memory_space<smem>>
    %189 = vector.extract_strided_slice %42 {offsets = [0, 0, 0, 0], sizes = [1, 1, 32, 32], strides = [1, 1, 1, 1]} : vector<1x4x32x32xf32> to vector<1x1x32x32xf32>
    %190 = vector.shape_cast %189 : vector<1x1x32x32xf32> to vector<1x32x32xf32>
    %191 = vector.broadcast %188 : f32 to vector<1x32x32xf32>
    %192 = arith.mulf %191, %190 : vector<1x32x32xf32>
    %c5_86 = arith.constant 5 : index
    %c1_87 = arith.constant 1 : index
    %193 = memref.load %arg2[%c5_86, %c1_87] : memref<8x4xf32, #tpu.memory_space<smem>>
    %194 = vector.extract_strided_slice %42 {offsets = [0, 1, 0, 0], sizes = [1, 1, 32, 32], strides = [1, 1, 1, 1]} : vector<1x4x32x32xf32> to vector<1x1x32x32xf32>
    %195 = vector.shape_cast %194 : vector<1x1x32x32xf32> to vector<1x32x32xf32>
    %196 = vector.broadcast %193 : f32 to vector<1x32x32xf32>
    %197 = arith.mulf %196, %195 : vector<1x32x32xf32>
    %198 = arith.addf %192, %197 : vector<1x32x32xf32>
    %c5_88 = arith.constant 5 : index
    %c2_89 = arith.constant 2 : index
    %199 = memref.load %arg2[%c5_88, %c2_89] : memref<8x4xf32, #tpu.memory_space<smem>>
    %200 = vector.extract_strided_slice %42 {offsets = [0, 2, 0, 0], sizes = [1, 1, 32, 32], strides = [1, 1, 1, 1]} : vector<1x4x32x32xf32> to vector<1x1x32x32xf32>
    %201 = vector.shape_cast %200 : vector<1x1x32x32xf32> to vector<1x32x32xf32>
    %202 = vector.broadcast %199 : f32 to vector<1x32x32xf32>
    %203 = arith.mulf %202, %201 : vector<1x32x32xf32>
    %204 = arith.addf %198, %203 : vector<1x32x32xf32>
    %c5_90 = arith.constant 5 : index
    %c3_91 = arith.constant 3 : index
    %205 = memref.load %arg2[%c5_90, %c3_91] : memref<8x4xf32, #tpu.memory_space<smem>>
    %206 = vector.extract_strided_slice %42 {offsets = [0, 3, 0, 0], sizes = [1, 1, 32, 32], strides = [1, 1, 1, 1]} : vector<1x4x32x32xf32> to vector<1x1x32x32xf32>
    %207 = vector.shape_cast %206 : vector<1x1x32x32xf32> to vector<1x32x32xf32>
    %208 = vector.broadcast %205 : f32 to vector<1x32x32xf32>
    %209 = arith.mulf %208, %207 : vector<1x32x32xf32>
    %210 = arith.addf %204, %209 : vector<1x32x32xf32>
    %c5_92 = arith.constant 5 : index
    %211 = memref.load %arg3[%c5_92] : memref<8xf32, #tpu.memory_space<smem>>
    %212 = vector.broadcast %211 : f32 to vector<1x32x32xf32>
    %213 = arith.addf %210, %212 : vector<1x32x32xf32>
    %c0_93 = arith.constant 0 : index
    %c5_94 = arith.constant 5 : index
    %c0_95 = arith.constant 0 : index
    %c0_96 = arith.constant 0 : index
    %214 = vector.load %arg9[%c0_93, %c5_94, %c0_95, %c0_96] : memref<1x8x32x32xf32, #tpu.memory_space<vmem>>, vector<1x1x32x32xf32>
    %215 = vector.shape_cast %214 : vector<1x1x32x32xf32> to vector<1x32x32xf32>
    %216 = vector.shape_cast %213 : vector<1x32x32xf32> to vector<1x1x32x32xf32>
    tpu.vector_store %arg9[%c0_93, %c5_94, %c0_95, %c0_96], %216 {strides = array<i32>} : memref<1x8x32x32xf32, #tpu.memory_space<vmem>>, vector<1x1x32x32xf32>,
    %c6 = arith.constant 6 : index
    %c0_97 = arith.constant 0 : index
    %217 = memref.load %arg2[%c6, %c0_97] : memref<8x4xf32, #tpu.memory_space<smem>>
    %218 = vector.extract_strided_slice %42 {offsets = [0, 0, 0, 0], sizes = [1, 1, 32, 32], strides = [1, 1, 1, 1]} : vector<1x4x32x32xf32> to vector<1x1x32x32xf32>
    %219 = vector.shape_cast %218 : vector<1x1x32x32xf32> to vector<1x32x32xf32>
    %220 = vector.broadcast %217 : f32 to vector<1x32x32xf32>
    %221 = arith.mulf %220, %219 : vector<1x32x32xf32>
    %c6_98 = arith.constant 6 : index
    %c1_99 = arith.constant 1 : index
    %222 = memref.load %arg2[%c6_98, %c1_99] : memref<8x4xf32, #tpu.memory_space<smem>>
    %223 = vector.extract_strided_slice %42 {offsets = [0, 1, 0, 0], sizes = [1, 1, 32, 32], strides = [1, 1, 1, 1]} : vector<1x4x32x32xf32> to vector<1x1x32x32xf32>
    %224 = vector.shape_cast %223 : vector<1x1x32x32xf32> to vector<1x32x32xf32>
    %225 = vector.broadcast %222 : f32 to vector<1x32x32xf32>
    %226 = arith.mulf %225, %224 : vector<1x32x32xf32>
    %227 = arith.addf %221, %226 : vector<1x32x32xf32>
    %c6_100 = arith.constant 6 : index
    %c2_101 = arith.constant 2 : index
    %228 = memref.load %arg2[%c6_100, %c2_101] : memref<8x4xf32, #tpu.memory_space<smem>>
    %229 = vector.extract_strided_slice %42 {offsets = [0, 2, 0, 0], sizes = [1, 1, 32, 32], strides = [1, 1, 1, 1]} : vector<1x4x32x32xf32> to vector<1x1x32x32xf32>
    %230 = vector.shape_cast %229 : vector<1x1x32x32xf32> to vector<1x32x32xf32>
    %231 = vector.broadcast %228 : f32 to vector<1x32x32xf32>
    %232 = arith.mulf %231, %230 : vector<1x32x32xf32>
    %233 = arith.addf %227, %232 : vector<1x32x32xf32>
    %c6_102 = arith.constant 6 : index
    %c3_103 = arith.constant 3 : index
    %234 = memref.load %arg2[%c6_102, %c3_103] : memref<8x4xf32, #tpu.memory_space<smem>>
    %235 = vector.extract_strided_slice %42 {offsets = [0, 3, 0, 0], sizes = [1, 1, 32, 32], strides = [1, 1, 1, 1]} : vector<1x4x32x32xf32> to vector<1x1x32x32xf32>
    %236 = vector.shape_cast %235 : vector<1x1x32x32xf32> to vector<1x32x32xf32>
    %237 = vector.broadcast %234 : f32 to vector<1x32x32xf32>
    %238 = arith.mulf %237, %236 : vector<1x32x32xf32>
    %239 = arith.addf %233, %238 : vector<1x32x32xf32>
    %c6_104 = arith.constant 6 : index
    %240 = memref.load %arg3[%c6_104] : memref<8xf32, #tpu.memory_space<smem>>
    %241 = vector.broadcast %240 : f32 to vector<1x32x32xf32>
    %242 = arith.addf %239, %241 : vector<1x32x32xf32>
    %c0_105 = arith.constant 0 : index
    %c6_106 = arith.constant 6 : index
    %c0_107 = arith.constant 0 : index
    %c0_108 = arith.constant 0 : index
    %243 = vector.load %arg9[%c0_105, %c6_106, %c0_107, %c0_108] : memref<1x8x32x32xf32, #tpu.memory_space<vmem>>, vector<1x1x32x32xf32>
    %244 = vector.shape_cast %243 : vector<1x1x32x32xf32> to vector<1x32x32xf32>
    %245 = vector.shape_cast %242 : vector<1x32x32xf32> to vector<1x1x32x32xf32>
    tpu.vector_store %arg9[%c0_105, %c6_106, %c0_107, %c0_108], %245 {strides = array<i32>} : memref<1x8x32x32xf32, #tpu.memory_space<vmem>>, vector<1x1x32x32xf32>,
    %c7 = arith.constant 7 : index
    %c0_109 = arith.constant 0 : index
    %246 = memref.load %arg2[%c7, %c0_109] : memref<8x4xf32, #tpu.memory_space<smem>>
    %247 = vector.extract_strided_slice %42 {offsets = [0, 0, 0, 0], sizes = [1, 1, 32, 32], strides = [1, 1, 1, 1]} : vector<1x4x32x32xf32> to vector<1x1x32x32xf32>
    %248 = vector.shape_cast %247 : vector<1x1x32x32xf32> to vector<1x32x32xf32>
    %249 = vector.broadcast %246 : f32 to vector<1x32x32xf32>
    %250 = arith.mulf %249, %248 : vector<1x32x32xf32>
    %c7_110 = arith.constant 7 : index
    %c1_111 = arith.constant 1 : index
    %251 = memref.load %arg2[%c7_110, %c1_111] : memref<8x4xf32, #tpu.memory_space<smem>>
    %252 = vector.extract_strided_slice %42 {offsets = [0, 1, 0, 0], sizes = [1, 1, 32, 32], strides = [1, 1, 1, 1]} : vector<1x4x32x32xf32> to vector<1x1x32x32xf32>
    %253 = vector.shape_cast %252 : vector<1x1x32x32xf32> to vector<1x32x32xf32>
    %254 = vector.broadcast %251 : f32 to vector<1x32x32xf32>
    %255 = arith.mulf %254, %253 : vector<1x32x32xf32>
    %256 = arith.addf %250, %255 : vector<1x32x32xf32>
    %c7_112 = arith.constant 7 : index
    %c2_113 = arith.constant 2 : index
    %257 = memref.load %arg2[%c7_112, %c2_113] : memref<8x4xf32, #tpu.memory_space<smem>>
    %258 = vector.extract_strided_slice %42 {offsets = [0, 2, 0, 0], sizes = [1, 1, 32, 32], strides = [1, 1, 1, 1]} : vector<1x4x32x32xf32> to vector<1x1x32x32xf32>
    %259 = vector.shape_cast %258 : vector<1x1x32x32xf32> to vector<1x32x32xf32>
    %260 = vector.broadcast %257 : f32 to vector<1x32x32xf32>
    %261 = arith.mulf %260, %259 : vector<1x32x32xf32>
    %262 = arith.addf %256, %261 : vector<1x32x32xf32>
    %c7_114 = arith.constant 7 : index
    %c3_115 = arith.constant 3 : index
    %263 = memref.load %arg2[%c7_114, %c3_115] : memref<8x4xf32, #tpu.memory_space<smem>>
    %264 = vector.extract_strided_slice %42 {offsets = [0, 3, 0, 0], sizes = [1, 1, 32, 32], strides = [1, 1, 1, 1]} : vector<1x4x32x32xf32> to vector<1x1x32x32xf32>
    %265 = vector.shape_cast %264 : vector<1x1x32x32xf32> to vector<1x32x32xf32>
    %266 = vector.broadcast %263 : f32 to vector<1x32x32xf32>
    %267 = arith.mulf %266, %265 : vector<1x32x32xf32>
    %268 = arith.addf %262, %267 : vector<1x32x32xf32>
    %c7_116 = arith.constant 7 : index
    %269 = memref.load %arg3[%c7_116] : memref<8xf32, #tpu.memory_space<smem>>
    %270 = vector.broadcast %269 : f32 to vector<1x32x32xf32>
    %271 = arith.addf %268, %270 : vector<1x32x32xf32>
    %c0_117 = arith.constant 0 : index
    %c7_118 = arith.constant 7 : index
    %c0_119 = arith.constant 0 : index
    %c0_120 = arith.constant 0 : index
    %272 = vector.load %arg9[%c0_117, %c7_118, %c0_119, %c0_120] : memref<1x8x32x32xf32, #tpu.memory_space<vmem>>, vector<1x1x32x32xf32>
    %273 = vector.shape_cast %272 : vector<1x1x32x32xf32> to vector<1x32x32xf32>
    %274 = vector.shape_cast %271 : vector<1x32x32xf32> to vector<1x1x32x32xf32>
    tpu.vector_store %arg9[%c0_117, %c7_118, %c0_119, %c0_120], %274 {strides = array<i32>} : memref<1x8x32x32xf32, #tpu.memory_space<vmem>>, vector<1x1x32x32xf32>,
    return
  }
  func.func @transform_0(%arg0: i32) -> i32 {
    %c0_i32 = arith.constant 0 : i32
    %c0_i32_0 = arith.constant 0 : i32
    return %c0_i32 : i32
  }
  func.func @transform_1(%arg0: i32) -> (i32, i32) {
    %c0_i32 = arith.constant 0 : i32
    %c0_i32_0 = arith.constant 0 : i32
    %c0_i32_1 = arith.constant 0 : i32
    return %c0_i32, %c0_i32_0 : i32, i32
  }
  func.func @transform_2(%arg0: i32) -> i32 {
    %c0_i32 = arith.constant 0 : i32
    %c0_i32_0 = arith.constant 0 : i32
    return %c0_i32 : i32
  }
  func.func @transform_3(%arg0: i32) -> (i32, i32, i32, i32) {
    %c0_i32 = arith.constant 0 : i32
    %c0_i32_0 = arith.constant 0 : i32
    %c0_i32_1 = arith.constant 0 : i32
    %c0_i32_2 = arith.constant 0 : i32
    return %arg0, %c0_i32, %c0_i32_0, %c0_i32_1 : i32, i32, i32, i32
  }
  func.func @transform_4(%arg0: i32) -> (i32, i32, i32, i32) {
    %c0_i32 = arith.constant 0 : i32
    %c0_i32_0 = arith.constant 0 : i32
    %c0_i32_1 = arith.constant 0 : i32
    %c0_i32_2 = arith.constant 0 : i32
    %c0_i32_3 = arith.constant 0 : i32
    return %c0_i32, %c0_i32_0, %c0_i32_1, %c0_i32_2 : i32, i32, i32, i32
  }
  func.func @transform_5(%arg0: i32) -> (i32, i32, i32, i32) {
    %c0_i32 = arith.constant 0 : i32
    %c0_i32_0 = arith.constant 0 : i32
    %c0_i32_1 = arith.constant 0 : i32
    %c0_i32_2 = arith.constant 0 : i32
    %c0_i32_3 = arith.constant 0 : i32
    return %c0_i32, %c0_i32_0, %c0_i32_1, %c0_i32_2 : i32, i32, i32, i32
  }
  func.func @transform_6(%arg0: i32) -> (i32, i32) {
    %c0_i32 = arith.constant 0 : i32
    %c0_i32_0 = arith.constant 0 : i32
    %c0_i32_1 = arith.constant 0 : i32
    return %c0_i32, %c0_i32_0 : i32, i32
  }
  func.func @transform_7(%arg0: i32) -> (i32, i32) {
    %c0_i32 = arith.constant 0 : i32
    %c0_i32_0 = arith.constant 0 : i32
    %c0_i32_1 = arith.constant 0 : i32
    return %c0_i32, %c0_i32_0 : i32, i32
  }
  func.func @transform_8(%arg0: i32) -> (i32, i32, i32, i32) {
    %c0_i32 = arith.constant 0 : i32
    %c0_i32_0 = arith.constant 0 : i32
    %c0_i32_1 = arith.constant 0 : i32
    %c0_i32_2 = arith.constant 0 : i32
    return %arg0, %c0_i32, %c0_i32_0, %c0_i32_1 : i32, i32, i32, i32
  }
}

</mosaic_0001>

<bundles_post_ra>
// kernel: modblock_forward.1
= control target key start
LH: loop header
LB: loop body
LE: loop exit
PB: predicated region body
PF: predicated region fallthrough
CT: control target
= control target key end

     0   :  { %s4190_s0 = inlined_call_operand.vmem [shape: f32[2], index: 0, kind: input, shape index: {}]   ;;  %s4191_s1 = inlined_call_operand.vmem [shape: f32[8,4], index: 1, kind: input, shape index: {}]   ;;  %s4192_s2 = inlined_call_operand.vmem [shape: f32[8], index: 2, kind: input, shape index: {}]   ;;  %s4193_s3 = inlined_call_operand.hbm [shape: f32[2,4,16,16], index: 3, kind: input, shape index: {}]   ;;  %s4194_s4 = inlined_call_operand.vmem [shape: f32[1,4,1,1], index: 4, kind: input, shape index: {}]   ;;  %s4195_s5 = inlined_call_operand.vmem [shape: f32[1,4,1,1], index: 5, kind: input, shape index: {}]   ;;  %s4196_s6 = inlined_call_operand.vmem [shape: f32[16,32], index: 6, kind: input, shape index: {}]   ;;  %s4197_s7 = inlined_call_operand.hbm [shape: f32[32,16], index: 7, kind: input, shape index: {}]   ;;  %s4198_s8 = inlined_call_operand.hbm [shape: f32[2,8,32,32], index: 8, kind: output, shape index: {}]  }
   0x1   :  { %4201 = sst [smem:[#allocation37_spill]] %s4190_s0 }
   0x2   :  { %4202 = sst [smem:[#allocation38_spill]] %s4191_s1 }
   0x3   :  { %4203 = sst [smem:[#allocation39_spill]] %s4192_s2 }
   0x4   :  { %4204 = sst [smem:[#allocation40_spill]] %s4193_s3 }
   0x5   :  { %13 = vsyncpa [#allocation5], 0 }
   0x6   :  { %14 = vsyncpa [#allocation7], 0 }
   0x7   :  { %15 = vsyncpa [#allocation3], 0 }
   0x8   :  { %17 = vsyncpa [#allocation3 + $0x1], 0 }
   0x9   :  { %18 = vsyncpa [#allocation11], 0 }
   0xa   :  { %19 = vsyncpa [#allocation4], 0 }
   0xb   :  { %21 = vsyncpa [#allocation4 + $0x1], 0  ;;  %s2997_s27 = smov 0   ;;  %s2999_s28 = smov 0  }
   0xc   :  { %s3001_s29 = smov 0   ;;  %s3003_s30 = smov 0  }
   0xd LB: > { %s3018_s9 = sadd.s32 4294967295, %s2940_s30   ;;  %s2540_s10 = sadd.s32 4294967294, %s2940_s30   ;;  %s2940_s30 = sphi %s3003_s30, %s4259_s30   ;;  %s2936_s29 = sphi %s3001_s29, %s4258_s29   ;;  %s2932_s28 = sphi %s2999_s28, %s4257_s28   ;;  %s2928_s27 = sphi %s2997_s27, %s4256_s27  }
   0xe   : > { %p110_p0 = scmp.ne.s32.totalorder %s2932_s28, %s2928_s27  ;;  %p111_p1 = scmp.eq.s32.totalorder %s3018_s9, 0 }
   0xf   : > { %p218_p2 = scmp.eq.s32.totalorder %s3018_s9, 1  ;;  %p224_p3 = scmp.eq.s32.totalorder %s2540_s10, 1 }
  0x10   : > { %p3027_p4 = por %p111_p1, %p110_p0  ;;  %p2541_p5 = scmp.ge.s32.totalorder %s2940_s30, 1 }
  0x11   : > { %p3032_p6 = por %p224_p3, %p110_p0  ;;  %p231_p7 = scmp.lt.s32.totalorder %s2940_s30, 3 }
  0x12   : > { %s4207_s1 = sld [smem:[#allocation38_spill]]  ;;  %s281_s26 = sshll.u32 %s4197_s7, 4  ;;  %s282_s26 = int_to_ptr.hbm [resolvable:$true] %s281_s26 }
  0x13   : > { %p3040_p8 = pnand %p2541_p5, %p231_p7  ;;  %s4209_s0 = sld [smem:[#allocation37_spill]] }
  0x14   : > { %s4211_s2 = sld [smem:[#allocation39_spill]]  ;;  %s2942_s10 = smov [#allocation6]  }
  0x15   : > { %p2651_p10 = pneg %p3040_p8  ;;  %s2943_s13 = smov [#allocation2]  }
  0x16   : > { %s2944_s14 = smov [#allocation8]   ;;  %s2945_s17 = smov [#allocation10]  }
  0x17   : > { %p3052_p11 = pnand %p2651_p10, %p111_p1  ;;  %s283_s18 = sshll.u32 %s2945_s17, 4  ;;  %s284_s18 = int_to_ptr.vmem [resolvable:$true] %s283_s18 }
  0x18   : > { %s253_s15 = sshll.u32 %s4207_s1, 4  ;;  %s4199_s21 = smov 128   ;;  %s254_s15 = int_to_ptr.vmem [resolvable:$true] %s253_s15 }
  0x19   : > { %s243_s19 = sshll.u32 %s4209_s0, 4  ;;  %p104_p13 = scmp.ne.s32.totalorder %s2936_s29, %s2932_s28  ;;  %s244_s19 = int_to_ptr.vmem [resolvable:$true] %s243_s19 }
  0x1a   : > { %s263_s23 = sshll.u32 %s4211_s2, 4  ;;  %p105_p0 = scmp.eq.s32.totalorder %s2940_s30, 0  ;;  %s264_s23 = int_to_ptr.vmem [resolvable:$true] %s263_s23 }
  0x1b   : > { %2657 = dma.vmem_to_smem (!%p3052_p11), %s254_s15, 128, %s2942_s10, [#allocation7]  }
  0x1c   : > { %2654 = dma.vmem_to_smem (!%p3052_p11), %s244_s19, 16, %s2943_s13, [#allocation5]  }
  0x1d   : > { %2660 = dma.vmem_to_smem (!%p3052_p11), %s264_s23, 16, %s2944_s14, [#allocation7]  }
  0x1e   : > { %s4200_s15 = smov 8   ;;  %s3074_s19 = sadd.s32 1, %s2940_s30  }
  0x1f   : > { %2663 = dma.hbm_to_vmem [thread:$0]  (!%p3052_p11), %s282_s26, 512, %s284_s18, [#allocation11], %s4199_s21, %s4199_s21, %s4200_s15  }
  0x20   : > { %s94_s22 = ssub.s32 %s2940_s30, %s3074_s19  ;;  %s97_s23 = sadd.s32 1, %s2936_s29 }
  0x21   : > { %p95_p12 = scmp.eq.s32.totalorder %s94_s22, 0  ;;  %p106_p3 = por %p105_p0, %p104_p13 }
  0x22   : > { %p3087_p5 = por %p218_p2, %p104_p13  ;;  %p2676_p7 = scmp.lt.s32.totalorder %s2940_s30, 2 }
  0x23   : > { %s3083_s24 = scalar_select %p95_p12, %s2936_s29, %s97_s23  }
  0x24   : > { %s297_s20 = sand.u32 1, %s2936_s29   ;;  %s2629_s26 = sshll.u32 %s2940_s30, 6 }
  0x25   : > { %s2547_s10 = sshll.u32 %s297_s20, 6  ;;  %s4213_s3 = sld [smem:[#allocation40_spill]] }
  0x26   : > { %s301_s18 = scalar_lea.vmem [#allocation9], %s2547_s10  ;;  %p3097_p10 = pnand %p2676_p7, %p106_p3 }
  0x27   : > { %s309_s22 = sshll.u32 %s301_s18, 4  ;;  %s298_s15 = scalar_lea.sflag [#allocation3], %s297_s20  ;;  %s310_s22 = int_to_ptr.vmem [resolvable:$true] %s309_s22 }
  0x28   : > { %p2836_p11 = pneg %p3097_p10 }
  0x2b   : > { %s306_s17 = scalar_lea.hbm %s4213_s3, %s2629_s26  ;;  %s2839_s13 = scalar_lea.hbm %s4213_s3, 128 }
  0x2c   : > { %s307_s21 = sshll.u32 %s306_s17, 4  ;;  %s308_s21 = int_to_ptr.hbm [resolvable:$true] %s307_s21 }
  0x2d   : > { %s2832_s0 = sshra.s32 %s308_s21, 4  ;;  %s2833_s0 = int_to_ptr.hbm [resolvable:$true] %s2832_s0 }
  0x2e   : > { %s2834_s1 = scalar_lea.hbm %s2833_s0, 64  ;;  %p2840_p0 = scmp.lt.s32.totalorder %s2833_s0, %s4213_s3 }
  0x2f   : > { %p2835_p2 = scmp.ne.s32.totalorder %s2833_s0, %s2834_s1  ;;  %p2841_p3 = scmp.lt.s32.totalorder %s2839_s13, %s2834_s1 }
  0x31   : > { %p2837_p12 = pnand %p2836_p11, %p2835_p2  ;;  %p2842_p7 = por %p2841_p3, %p2840_p0 }
  0x33   : > { %p2838_p13 = pneg %p2837_p12 }
  0x35   : > { %p2843_p9 = pnand %p2842_p7, %p2838_p13 }
  0x37   : > { %2846 = shalt.err (!%p2843_p9)
}
  0x38   : > { %s4215_s20 = smov 8   ;;  %s4216_s18 = smov 128  }
  0x39   : > { %2667 = dma.hbm_to_vmem [thread:$0]  (!%p3097_p10), %s308_s21, 1024, %s310_s22, %s298_s15, %s4216_s18, %s4216_s18, %s4215_s20  }
  0x3a   : > { %321 = sbr.rel (%p3040_p8) target bundleno = 811 (0x32b), region = 52 }
  0x3f   : > { %2907 = dma.done.wait (%p111_p1), [#allocation5], 16  }
  0x40   : > { %2909 = vsyncadd (%p111_p1), [#allocation5], 4294967280 }
  0x41   : > { %2911 = dma.done.wait (%p111_p1), [#allocation7], 144  }
  0x42   : > { %2913 = vsyncadd (%p111_p1), [#allocation7], 4294967152  ;;  %s3125_s0 = sand.u32 1, %s2932_s28  }
  0x43   : > { %s2554_s1 = sshll.u32 %s3125_s0, 6  ;;  %s339_s16 = scalar_lea.sflag [#allocation3], %s3125_s0 }
  0x44   : > { %s3129_s21 = scalar_lea.vmem [#allocation9], %s2554_s1 }
  0x45   : > { %2915 = dma.done.wait (%p3027_p4), %s339_s16, 1024  }
  0x46   : > { %2917 = vsyncadd (%p3027_p4), %s339_s16, 4294966272 }
  0x47   : > { %2919 = dma.done.wait (%p111_p1), [#allocation11], 512  }
  0x48   : > { %2921 = vsyncadd (%p111_p1), [#allocation11], 4294966784 }
  0x49   : > { %353 = sfence }
  0x4a   : > { %v2727_v0 = vld [vmem:[%s4194_s4 + $0x1] ss:$0 sm:$0xff]  ;;  %v2948_v1 = vmov 0   ;;  %v2728_v2 = vld [vmem:[%s4194_s4] ss:$0 sm:$0xff]  ;;  %v2949_v9 = vmov 4.0  }
  0x4b   : > { %2725 = vset.pattern.permute.xlu1 %v2948_v1  ;;  %2724 = vset.pattern.permute.xlu0 %v2948_v1  ;;  %v2733_v3 = vld [vmem:[%s4194_s4 + $0x2] ss:$0 sm:$0xff]  ;;  %v2729_v4 = vld [vmem:[%s4195_s5 + $0x1] ss:$0 sm:$0xff]  ;;  %v2730_v5 = vld [vmem:[%s4195_s5] ss:$0 sm:$0xff]  ;;  %2735 = vrcp.f32 %v2949_v9 }
  0x4c   : > { %493 = vperm.xlu1 %2725, %v2727_v0   ;;  %2726 = vset.pattern.permute.xlu2 %v2948_v1  ;;  %v2734_v6 = vld [vmem:[%s4195_s5 + $0x2] ss:$0 sm:$0xff]  ;;  %v2731_v7 = vld [vmem:[%s4195_s5 + $0x3] ss:$0 sm:$0xff]  ;;  %v383_v13 = vld [vmem:[%s3129_s21 + $0x8] sm:$0xff]  ;;  %vm390_vm0 = vcmask 130048  }
  0x4d   : > { %489 = vperm.xlu0 %2724, %v2728_v2   ;;  %497 = vperm.xlu2 %2726, %v2733_v3   ;;  %v2732_v8 = vld [vmem:[%s4194_s4 + $0x3] ss:$0 sm:$0xff]  ;;  %v384_v14 = vld [vmem:[%s3129_s21 + $0x10] sm:$0xff]  ;;  %v385_v15 = vld [vmem:[%s3129_s21 + $0x18] sm:$0xff]  ;;  %v398_v18 = vsel %vm390_vm0, %v383_v13, 0.0  ;;  %s1982_s13 = sld [smem:[#allocation2]] }
  0x4e   : > { %v382_v12 = vld [vmem:[%s3129_s21] sm:$0xff]  ;;  %v392_v17 = vsel %vm390_vm0, %v384_v14, 0.0  ;;  %v387_v21 = vld [vmem:[%s3129_s21 + $0x28] sm:$0xff]  ;;  %v399_v23 = vsel %vm390_vm0, %v385_v15, 0.0  ;;  %v388_v28 = vld [vmem:[%s3129_s21 + $0x30] sm:$0xff]  ;;  %s2557_s14 = sld [smem:[#allocation2 + $0x1]] }
  0x4f   : > { %v391_v16 = vsel %vm390_vm0, %v382_v12, 0.0  ;;  %v386_v20 = vld [vmem:[%s3129_s21 + $0x20] sm:$0xff]  ;;  %v400_v25 = vadd.f32 %v399_v23, %v398_v18  ;;  %v401_v26 = vsel %vm390_vm0, %v387_v21, 0.0  ;;  %v389_v29 = vld [vmem:[%s3129_s21 + $0x38] sm:$0xff]  ;;  %v396_v31 = vsel %vm390_vm0, %v388_v28, 0.0  ;;  %s3489_s17 = sld [smem:[#allocation6]] }
  0x50   : > { %v393_v22 = vadd.f32 %v392_v17, %v391_v16  ;;  %v394_v24 = vsel %vm390_vm0, %v386_v20, 0.0  ;;  %v403_v33 = vsel %vm390_vm0, %v389_v29, 0.0  ;;  %s3491_s20 = sld [smem:[#allocation6 + $0x80]] }
  0x51   : > { %v2736_v10 = vpop.eup %2735  ;;  %v402_v32 = vadd.f32 %v401_v26, %v400_v25  ;;  %s3493_s18 = sld [smem:[#allocation6 + $0x100]] }
  0x52   : > { %v406_v11 = vmul.f32 4.0, %v2736_v10  ;;  %v395_v30 = vadd.f32 %v394_v24, %v393_v22  ;;  %vm410_vm1 = vweird.f32 %v2736_v10  ;;  %s3495_s1 = sld [smem:[#allocation6 + $0x180]] }
  0x53   : > { %v404_v36 = vadd.f32 %v403_v33, %v402_v32  ;;  %s3501_s16 = sld [smem:[#allocation6 + $0x200]] }
  0x54   : > { %529 = vperm.xlu1 %2725, %v2729_v4   ;;  %v407_v19 = vsub.f32 1.0, %v406_v11  ;;  %v397_v35 = vadd.f32 %v396_v31, %v395_v30  ;;  %s3503_s15 = sld [smem:[#allocation6 + $0x280]] }
  0x55   : > { %525 = vperm.xlu0 %2724, %v2730_v5   ;;  %533 = vperm.xlu2 %2726, %v2734_v6   ;;  %s3505_s22 = sld [smem:[#allocation6 + $0x300]] }
  0x56   : > { %v408_v27 = vmul.f32 %v2736_v10, %v407_v19  ;;  %s3507_s23 = sld [smem:[#allocation6 + $0x380]] }
  0x57   : > { %s3512_s21 = sld [smem:[#allocation6 + $0x1]] }
  0x58   : > { %v409_v34 = vadd.f32 %v2736_v10, %v408_v27  ;;  %s3519_s26 = sld [smem:[#allocation6 + $0x81]] }
  0x59   : > { %s3521_s11 = sld [smem:[#allocation6 + $0x101]] }
  0x5a   : > { %v411_v37 = vsel %vm410_vm1, %v2736_v10, %v409_v34  ;;  %s3523_s10 = sld [smem:[#allocation6 + $0x181]] }
  0x5b   : > { %v412_v38 = vmul.f32 %v411_v37, %v397_v35  ;;  %v413_v39 = vmul.f32 %v411_v37, %v404_v36  ;;  %s3531_s2 = sld [smem:[#allocation6 + $0x301]] }
  0x5c   : > { %537 = vperm.xlu1 %2725, %v2731_v7   ;;  %s3536_s3 = sld [smem:[#allocation6 + $0x381]] }
  0x5d   : > { %501 = vperm.xlu0 %2724, %v2732_v8   ;;  %v3179_v40 = vsub.f32 %v382_v12, %v412_v38  ;;  %v3181_v41 = vsub.f32 %v384_v14, %v412_v38  ;;  %v3183_v42 = vsub.f32 %v383_v13, %v413_v39  ;;  %v3185_v43 = vsub.f32 %v385_v15, %v413_v39  ;;  %v557_v12 = vld [vmem:[%s4196_s6 + $0x8] sm:$0xff]  ;;  %v556_v14 = vld [vmem:[%s4196_s6] sm:$0xff] }
  0x5e   : > { %v3187_v44 = vsub.f32 %v386_v20, %v412_v38  ;;  %v3193_v47 = vsub.f32 %v387_v21, %v413_v39  ;;  %v3199_v50 = vsub.f32 %v388_v28, %v412_v38  ;;  %v3205_v54 = vsub.f32 %v389_v29, %v413_v39 }
  0x5f   : > { %v422_v45 = vmul.f32 %v3179_v40, %v3179_v40  ;;  %v424_v46 = vmul.f32 %v3181_v41, %v3181_v41  ;;  %v423_v48 = vmul.f32 %v3183_v42, %v3183_v42  ;;  %v425_v49 = vmul.f32 %v3185_v43, %v3185_v43 }
  0x60   : > { %v426_v51 = vmul.f32 %v3187_v44, %v3187_v44  ;;  %v427_v55 = vmul.f32 %v3193_v47, %v3193_v47  ;;  %v428_v59 = vmul.f32 %v3199_v50, %v3199_v50  ;;  %v429_v62 = vmul.f32 %v3205_v54, %v3205_v54 }
  0x61   : > { %v430_v52 = vsel %vm390_vm0, %v422_v45, 0.0  ;;  %v431_v53 = vsel %vm390_vm0, %v424_v46, 0.0  ;;  %v437_v56 = vsel %vm390_vm0, %v423_v48, 0.0  ;;  %v438_v57 = vsel %vm390_vm0, %v425_v49, 0.0 }
  0x62   : > { %v432_v58 = vadd.f32 %v431_v53, %v430_v52  ;;  %v433_v60 = vsel %vm390_vm0, %v426_v51, 0.0  ;;  %v439_v61 = vadd.f32 %v438_v57, %v437_v56  ;;  %v440_v63 = vsel %vm390_vm0, %v427_v55, 0.0 }
  0x63   : > { %v435_v1 = vsel %vm390_vm0, %v428_v59, 0.0  ;;  %v442_v3 = vsel %vm390_vm0, %v429_v62, 0.0  ;;  %v596_v13 = vand.u32 4294901760, %v557_v12  ;;  %v598_v18 = vand.u32 4294901760, %v556_v14 }
  0x64   : > { %v434_v0 = vadd.f32 %v433_v60, %v432_v58  ;;  %v441_v2 = vadd.f32 %v440_v63, %v439_v61 }
  0x65   : > { %v680_v17 = vsub.f32 %v557_v12, %v596_v13  ;;  %800 = vmatpush.msra.mxu3 %v596_v13  ;;  %597 = vmatpush.msra.mxu0 %v596_v13  ;;  %v686_v20 = vsub.f32 %v556_v14, %v598_v18 }
  0x66   : > { %v436_v4 = vadd.f32 %v435_v1, %v434_v0  ;;  %v443_v5 = vadd.f32 %v442_v3, %v441_v2 }
  0x67   : > { %v681_v19 = vand.u32 4294901760, %v680_v17  ;;  %740 = vmatpush.msra.mxu2 %v680_v17  ;;  %802 = vmatpush.msra.mxu3 %v598_v18  ;;  %v687_v24 = vand.u32 4294901760, %v686_v20 }
  0x68   : > { %v444_v6 = vmul.f32 %v436_v4, %v411_v37  ;;  %v445_v7 = vmul.f32 %v443_v5, %v411_v37  ;;  %599 = vmatpush.msra.mxu0 %v598_v18 }
  0x69   : > { %v682_v23 = vsub.f32 %v680_v17, %v681_v19  ;;  %743 = vmatpush.msra.mxu2 %v686_v20  ;;  %v688_v26 = vsub.f32 %v686_v20, %v687_v24 }
  0x6a   : > { %v446_v8 = vadd.f32 1e-05, %v444_v6  ;;  %v447_v9 = vadd.f32 1e-05, %v445_v7  ;;  %869 = vmatpush.msrb.mxu0 %v681_v19 }
  0x6b   : > { %v683_v25 = vand.u32 4294901760, %v682_v23  ;;  %v689_v29 = vand.u32 4294901760, %v688_v26 }
  0x6c   : > { %2737 = vrsqrt.f32 %v446_v8  ;;  %873 = vmatpush.msrb.mxu0 %v687_v24  ;;  %vm454_vm2 = vweird.f32 %v446_v8  ;;  %vm464_vm4 = vweird.f32 %v447_v9 }
  0x6d   : > { %2739 = vrsqrt.f32 %v447_v9  ;;  %684 = vmatpush.msra.mxu1 %v683_v25 }
  0x6f   : > { %690 = vmatpush.msra.mxu1 %v689_v29 }
  0x71   : > { %922 = vmatpush.msrb.mxu1 %v596_v13 }
  0x72   : > { %v2738_v10 = vpop.eup %2737 }
  0x73   : > { %v2740_v11 = vpop.eup %2739  ;;  %v449_v15 = vmul.f32 %v2738_v10, %v446_v8  ;;  %vm455_vm3 = vweird.f32 %v2738_v10  ;;  %924 = vmatpush.msrb.mxu1 %v598_v18 }
  0x74   : > { %v459_v16 = vmul.f32 %v2740_v11, %v447_v9  ;;  %vm465_vm5 = vweird.f32 %v2740_v11  ;;  %vm456_vm6 = vmor %vm454_vm2, %vm455_vm3 }
  0x75   : > { %v450_v21 = vmul.f32 %v2738_v10, %v449_v15  ;;  %vm466_vm7 = vmor %vm464_vm4, %vm465_vm5  ;;  %vm2076_vm4 = vcmask 261120  }
  0x76   : > { %v460_v22 = vmul.f32 %v2740_v11, %v459_v16 }
  0x77   : > { %v451_v27 = vmul.f32 0.5, %v450_v21 }
  0x78   : > { %v461_v28 = vmul.f32 0.5, %v460_v22 }
  0x79   : > { %v452_v30 = vsub.f32 1.5, %v451_v27 }
  0x7a   : > { %v462_v31 = vsub.f32 1.5, %v461_v28 }
  0x7b   : > { %v453_v32 = vmul.f32 %v2738_v10, %v452_v30 }
  0x7c   : > { %v463_v33 = vmul.f32 %v2740_v11, %v462_v31 }
  0x7d   : > { %v457_v34 = vsel %vm456_vm6, %v2738_v10, %v453_v32 }
  0x7e   : > { %v3225_v35 = vsel %vm466_vm7, %v2740_v11, %v463_v33  ;;  %v468_v38 = vmul.f32 %v457_v34, %v3179_v40  ;;  %v470_v45 = vmul.f32 %v457_v34, %v3181_v41  ;;  %v472_v61 = vmul.f32 %v457_v34, %v3187_v44 }
  0x7f   : > { %v469_v39 = vmul.f32 %v3225_v35, %v3183_v42  ;;  %v471_v56 = vmul.f32 %v3225_v35, %v3185_v43  ;;  %v473_v7 = vmul.f32 %v3225_v35, %v3193_v47  ;;  %v474_v47 = vmul.f32 %v457_v34, %v3199_v50 }
  0x80   : > { %v475_v27 = vmul.f32 %v3225_v35, %v3205_v54 }
  0xa7   : > { %v498_v58 = vpop.permute.xlu2 %497 }
  0xa8   : > { %v508_v2 = vmul.f32 %v498_v58, %v472_v61  ;;  %v509_v13 = vmul.f32 %v498_v58, %v473_v7 }
  0xaf   : > { %v534_v5 = vpop.permute.xlu2 %533 }
  0xb0   : > { %v544_v8 = vadd.f32 %v534_v5, %v508_v2  ;;  %v545_v17 = vadd.f32 %v534_v5, %v509_v13 }
  0xbe   : > { %v494_v37 = vpop.permute.xlu1 %493 }
  0xbf   : > { %v490_v36 = vpop.permute.xlu0 %489  ;;  %v506_v49 = vmul.f32 %v494_v37, %v470_v45  ;;  %v507_v40 = vmul.f32 %v494_v37, %v471_v56 }
  0xc0   : > { %v504_v46 = vmul.f32 %v490_v36, %v468_v38  ;;  %v505_v48 = vmul.f32 %v490_v36, %v469_v39 }
  0xc6   : > { %v530_v55 = vpop.permute.xlu1 %529 }
  0xc7   : > { %v526_v51 = vpop.permute.xlu0 %525  ;;  %v542_v57 = vadd.f32 %v530_v55, %v506_v49  ;;  %v543_v60 = vadd.f32 %v530_v55, %v507_v40 }
  0xc8   : > { %v540_v52 = vadd.f32 %v526_v51, %v504_v46  ;;  %v541_v53 = vadd.f32 %v526_v51, %v505_v48 }
  0xca   : > { %2741 = vtanh.f32 %v540_v52 }
  0xcb   : > { %2743 = vtanh.f32 %v541_v53 }
  0xcc   : > { %2745 = vtanh.f32 %v542_v57 }
  0xcd   : > { %2747 = vtanh.f32 %v543_v60 }
  0xce   : > { %2749 = vtanh.f32 %v544_v8  ;;  %v538_v50 = vpop.permute.xlu1 %537 }
  0xcf   : > { %v502_v21 = vpop.permute.xlu0 %501  ;;  %2751 = vtanh.f32 %v545_v17 }
  0xd0   : > { %v2742_v59 = vpop.eup %2741  ;;  %v510_v23 = vmul.f32 %v502_v21, %v474_v47  ;;  %v511_v33 = vmul.f32 %v502_v21, %v475_v27 }
  0xd1   : > { %v2744_v42 = vpop.eup %2743  ;;  %v559_v41 = vsel %vm390_vm0, %v2742_v59, 0 }
  0xd2   : > { %v3235_v62 = vand.u32 4294901760, %v559_v41  ;;  %v562_v63 = vsel %vm390_vm0, %v2744_v42, 0  ;;  %v2746_v43 = vpop.eup %2745  ;;  %v546_v28 = vadd.f32 %v538_v50, %v510_v23  ;;  %v547_v38 = vadd.f32 %v538_v50, %v511_v33  ;;  %v959_v50 = vld [vmem:[#allocation10 + $0x8] sm:$0xff] }
  0xd3   : > { %v3238_v0 = vand.u32 4294901760, %v562_v63  ;;  %v565_v44 = vsel %vm390_vm0, %v2746_v43, 0  ;;  %v2748_v12 = vpop.eup %2747  ;;  %v966_v33 = vsel %vm390_vm0, %v959_v50, 0 }
  0xd4   : > { %692 = vmatmul.f32.vlgmr.msra.gmra.mxu1 %v3235_v62  ;;  %v601_v1 = vsub.f32 %v559_v41, %v3235_v62  ;;  %v3246_v11 = vand.u32 4294901760, %v565_v44  ;;  %v568_v16 = vsel %vm390_vm0, %v2748_v12, 0  ;;  %v2750_v22 = vpop.eup %2749  ;;  %2753 = vtanh.f32 %v546_v28 }
  0xd5   : > { %v609_v4 = vsub.f32 %v562_v63, %v3238_v0  ;;  %v3252_v20 = vand.u32 4294901760, %v568_v16  ;;  %v571_v26 = vsel %vm390_vm0, %v2750_v22, 0  ;;  %v2752_v32 = vpop.eup %2751  ;;  %2755 = vtanh.f32 %v547_v38 }
  0xd6   : > { %746 = vmatmul.f32.vlgmr.msra.gmra.mxu2 %v601_v1  ;;  %v602_v3 = vand.u32 4294901760, %v601_v1  ;;  %v617_v15 = vsub.f32 %v565_v44, %v3246_v11  ;;  %v632_v31 = vand.u32 4294901760, %v571_v26  ;;  %v574_v37 = vsel %vm390_vm0, %v2752_v32, 0 }
  0xd7   : > { %v610_v10 = vand.u32 4294901760, %v609_v4  ;;  %v625_v25 = vsub.f32 %v568_v16, %v3252_v20  ;;  %v640_v54 = vand.u32 4294901760, %v574_v37 }
  0xd8   : > { %806 = vmatmul.f32.vlgmr.msra.gmra.mxu3 %v602_v3  ;;  %v603_v6 = vsub.f32 %v601_v1, %v602_v3  ;;  %v618_v19 = vand.u32 4294901760, %v617_v15  ;;  %v633_v36 = vsub.f32 %v571_v26, %v632_v31 }
  0xd9   : > { %v611_v14 = vsub.f32 %v609_v4, %v610_v10  ;;  %v626_v30 = vand.u32 4294901760, %v625_v25  ;;  %v641_v48 = vsub.f32 %v574_v37, %v640_v54 }
  0xda   : > { %v604_v9 = vand.u32 4294901760, %v603_v6  ;;  %v619_v24 = vsub.f32 %v617_v15, %v618_v19  ;;  %v634_v45 = vand.u32 4294901760, %v633_v36  ;;  %v2754_v35 = vpop.eup %2753 }
  0xdb   : > { %v612_v18 = vand.u32 4294901760, %v611_v14  ;;  %v627_v34 = vsub.f32 %v625_v25, %v626_v30  ;;  %v577_v49 = vsel %vm390_vm0, %v2754_v35, 0  ;;  %v642_v52 = vand.u32 4294901760, %v641_v48  ;;  %v2756_v55 = vpop.eup %2755  ;;  %v960_v35 = vld [vmem:[#allocation10 + $0x10] sm:$0xff] }
  0xdc   : > { %605 = vmatmul.f32.vlgmr.msra.gmra.mxu0 %v604_v9  ;;  %696 = vmatmul.f32.gmra.mxu1 %v3238_v0  ;;  %v620_v29 = vand.u32 4294901760, %v619_v24  ;;  %v635_v46 = vsub.f32 %v633_v36, %v634_v45  ;;  %v648_v53 = vand.u32 4294901760, %v577_v49  ;;  %v580_v58 = vsel %vm390_vm0, %v2756_v55, 0 }
  0xdd   : > { %v628_v39 = vand.u32 4294901760, %v627_v34  ;;  %v643_v56 = vsub.f32 %v641_v48, %v642_v52  ;;  %v656_v42 = vand.u32 4294901760, %v580_v58  ;;  %v969_v55 = vsel %vm390_vm0, %v960_v35, 0 }
  0xde   : > { %751 = vmatmul.f32.gmra.mxu2 %v609_v4  ;;  %v636_v51 = vand.u32 4294901760, %v635_v46  ;;  %v649_v57 = vsub.f32 %v577_v49, %v648_v53 }
  0xdf   : > { %v644_v40 = vand.u32 4294901760, %v643_v56  ;;  %v657_v60 = vsub.f32 %v580_v58, %v656_v42 }
  0xe0   : > { %812 = vmatmul.f32.gmra.mxu3 %v610_v10  ;;  %v650_v59 = vand.u32 4294901760, %v649_v57 }
  0xe1   : > { %v658_v63 = vand.u32 4294901760, %v657_v60 }
  0xe2   : > { %v651_v41 = vsub.f32 %v649_v57, %v650_v59 }
  0xe3   : > { %v659_v43 = vsub.f32 %v657_v60, %v658_v63 }
  0xe4   : > { %613 = vmatmul.f32.gmra.mxu0 %v612_v18  ;;  %700 = vmatmul.f32.gmra.mxu1 %v3246_v11  ;;  %v652_v61 = vand.u32 4294901760, %v651_v41  ;;  %v958_v18 = vld [vmem:[#allocation10] sm:$0xff]  ;;  %v3313_v41 = vand.u32 4294901760, %v969_v55 }
  0xe5   : > { %v660_v1 = vand.u32 4294901760, %v659_v43  ;;  %v963_v21 = vsel %vm390_vm0, %v958_v18, 0 }
  0xe6   : > { %756 = vmatmul.f32.gmra.mxu2 %v617_v15  ;;  %v3288_v23 = vand.u32 4294901760, %v963_v21 }
  0xe8   : > { %818 = vmatmul.f32.gmra.mxu3 %v618_v19 }
  0xec   : > { %621 = vmatmul.f32.gmra.mxu0 %v620_v29  ;;  %704 = vmatmul.f32.gmra.mxu1 %v3252_v20  ;;  %v3291_v29 = vsub.f32 %v963_v21, %v3288_v23 }
  0xee   : > { %761 = vmatmul.f32.gmra.mxu2 %v625_v25  ;;  %v3295_v34 = vand.u32 4294901760, %v3291_v29 }
  0xf0   : > { %824 = vmatmul.f32.gmra.mxu3 %v626_v30 }
  0xf4   : > { %629 = vmatmul.f32.gmra.mxu0 %v628_v39  ;;  %708 = vmatmul.f32.gmra.mxu1 %v632_v31 }
  0xf6   : > { %766 = vmatmul.f32.gmra.mxu2 %v633_v36  ;;  %v3297_v36 = vand.u32 4294901760, %v966_v33 }
  0xf8   : > { %830 = vmatmul.f32.gmra.mxu3 %v634_v45  ;;  %v3304_v49 = vsub.f32 %v966_v33, %v3297_v36 }
  0xfc   : > { %637 = vmatmul.f32.gmra.mxu0 %v636_v51  ;;  %712 = vmatmul.f32.gmra.mxu1 %v640_v54 }
  0xfe   : > { %771 = vmatmul.f32.gmra.mxu2 %v641_v48  ;;  %v995_v48 = vsub.f32 %v3291_v29, %v3295_v34 }
 0x100   : > { %836 = vmatmul.f32.gmra.mxu3 %v642_v52 }
 0x104   : > { %645 = vmatmul.f32.gmra.mxu0 %v644_v40  ;;  %716 = vmatmul.f32.gmra.mxu1 %v648_v53 }
 0x106   : > { %776 = vmatmul.f32.gmra.mxu2 %v649_v57 }
 0x108   : > { %842 = vmatmul.f32.gmra.mxu3 %v650_v59  ;;  %v3308_v59 = vand.u32 4294901760, %v995_v48 }
 0x10c   : > { %653 = vmatmul.f32.gmra.mxu0 %v652_v61  ;;  %720 = vmatmul.f32.gmra.mxu1 %v656_v42 }
 0x10e   : > { %781 = vmatmul.f32.gmra.mxu2 %v657_v60 }
 0x110   : > { %848 = vmatmul.f32.gmra.mxu3 %v658_v63 }
 0x114   : > { %661 = vmatmul.f32.gmra.mxu0 %v660_v1  ;;  %926 = vmatmul.f32.vlgmr.msrb.gmra.mxu1 %v3235_v62  ;;  %v961_v1 = vld [vmem:[#allocation10 + $0x18] sm:$0xff] }
 0x11c   : > { %875 = vmatmul.f32.vlgmr.msrb.gmra.mxu0 %v3235_v62  ;;  %930 = vmatmul.f32.gmra.mxu1 %v3238_v0 }
 0x124   : > { %879 = vmatmul.f32.gmra.mxu0 %v3238_v0  ;;  %934 = vmatmul.f32.gmra.mxu1 %v3246_v11 }
 0x12c   : > { %883 = vmatmul.f32.gmra.mxu0 %v3246_v11  ;;  %938 = vmatmul.f32.gmra.mxu1 %v3252_v20 }
 0x134   : > { %887 = vmatmul.f32.gmra.mxu0 %v3252_v20  ;;  %942 = vmatmul.f32.gmra.mxu1 %v632_v31 }
 0x13c   : > { %891 = vmatmul.f32.gmra.mxu0 %v632_v31  ;;  %946 = vmatmul.f32.gmra.mxu1 %v640_v54 }
 0x144   : > { %895 = vmatmul.f32.gmra.mxu0 %v640_v54  ;;  %950 = vmatmul.f32.gmra.mxu1 %v648_v53 }
 0x14c   : > { %899 = vmatmul.f32.gmra.mxu0 %v648_v53  ;;  %954 = vmatmul.f32.gmra.mxu1 %v656_v42 }
 0x151   : > { %v693_v62 = vpop.f32.mrf.mxu1 }
 0x154   : > { %903 = vmatmul.f32.gmra.mxu0 %v656_v42  ;;  %v3311_v42 = vand.u32 4294901760, %v3304_v49 }
 0x159   : > { %v606_v2 = vpop.f32.mrf.mxu0  ;;  %v697_v3 = vpop.f32.mrf.mxu1 }
 0x15a   : > { %v747_v12 = vpop.f32.mrf.mxu2  ;;  %v694_v16 = vadd.f32 %v693_v62, %v606_v2 }
 0x15b   : > { %v807_v15 = vpop.f32.mrf.mxu3 }
 0x15c   : > { %v748_v20 = vadd.f32 %v747_v12, %v694_v16 }
 0x15e   : > { %v808_v24 = vadd.f32 %v807_v15, %v748_v20  ;;  %v972_v15 = vsel %vm390_vm0, %v961_v1, 0 }
 0x15f   : > { %v3331_v20 = vand.u32 4294901760, %v972_v15 }
 0x161   : > { %v614_v0 = vpop.f32.mrf.mxu0  ;;  %v701_v4 = vpop.f32.mrf.mxu1 }
 0x162   : > { %v752_v19 = vpop.f32.mrf.mxu2  ;;  %v698_v25 = vadd.f32 %v697_v3, %v614_v0 }
 0x163   : > { %v813_v22 = vpop.f32.mrf.mxu3 }
 0x164   : > { %v753_v30 = vadd.f32 %v752_v19, %v698_v25 }
 0x166   : > { %v814_v37 = vadd.f32 %v813_v22, %v753_v30  ;;  %v3342_v30 = vsub.f32 %v972_v15, %v3331_v20 }
 0x169   : > { %v622_v5 = vpop.f32.mrf.mxu0  ;;  %v705_v44 = vpop.f32.mrf.mxu1 }
 0x16a   : > { %v757_v31 = vpop.f32.mrf.mxu2  ;;  %v702_v38 = vadd.f32 %v701_v4, %v622_v5  ;;  %v1003_v4 = vsub.f32 %v3304_v49, %v3311_v42  ;;  %v3322_v5 = vsub.f32 %v969_v55, %v3313_v41 }
 0x16b   : > { %v819_v45 = vpop.f32.mrf.mxu3 }
 0x16c   : > { %v758_v51 = vadd.f32 %v757_v31, %v702_v38  ;;  %v3326_v18 = vand.u32 4294901760, %v1003_v4  ;;  %v3329_v19 = vand.u32 4294901760, %v3322_v5 }
 0x16e   : > { %v820_v60 = vadd.f32 %v819_v45, %v758_v51  ;;  %v3355_v45 = vand.u32 4294901760, %v3342_v30 }
 0x171   : > { %v630_v6 = vpop.f32.mrf.mxu0  ;;  %v3271_v7 = vpop.f32.mrf.mxu1 }
 0x172   : > { %v762_v57 = vpop.f32.mrf.mxu2  ;;  %v706_v40 = vadd.f32 %v705_v44, %v630_v6 }
 0x173   : > { %v825_v0 = vpop.f32.mrf.mxu3 }
 0x174   : > { %v763_v3 = vadd.f32 %v762_v57, %v706_v40 }
 0x176   : > { %v826_v21 = vadd.f32 %v825_v0, %v763_v3 }
 0x179   : > { %v3273_v8 = vpop.f32.mrf.mxu0  ;;  %v3275_v9 = vpop.f32.mrf.mxu1 }
 0x17a   : > { %v710_v22 = vadd.f32 %v3271_v7, %v3273_v8 }
 0x181   : > { %v3277_v10 = vpop.f32.mrf.mxu0  ;;  %v3279_v11 = vpop.f32.mrf.mxu1 }
 0x189   : > { %v3281_v13 = vpop.f32.mrf.mxu0  ;;  %v3283_v14 = vpop.f32.mrf.mxu1 }
 0x191   : > { %v3285_v47 = vpop.f32.mrf.mxu0  ;;  %v927_v17 = vpop.f32.mrf.mxu1 }
 0x199   : > { %v876_v26 = vpop.f32.mrf.mxu0  ;;  %v931_v28 = vpop.f32.mrf.mxu1 }
 0x19a   : > { %v877_v27 = vadd.f32 %v876_v26, %v808_v24  ;;  %v767_v24 = vpop.f32.mrf.mxu2 }
 0x19b   : > { %v768_v31 = vadd.f32 %v767_v24, %v710_v22 }
 0x19c   : > { %v928_v32 = vadd.f32 %v927_v17, %v877_v27 }
 0x19e   : > { %v3299_v39 = vand.u32 4294901760, %v928_v32 }
 0x1a0   : > { %v1046_v53 = vsub.f32 %v928_v32, %v3299_v39  ;;  %v831_v32 = vpop.f32.mrf.mxu3 }
 0x1a1   : > { %v880_v54 = vpop.f32.mrf.mxu0  ;;  %v935_v56 = vpop.f32.mrf.mxu1 }
 0x1a2   : > { %v881_v46 = vadd.f32 %v880_v54, %v814_v37  ;;  %v1047_v63 = vand.u32 4294901760, %v1046_v53  ;;  %v714_v37 = vadd.f32 %v3275_v9, %v3277_v10  ;;  %v832_v54 = vadd.f32 %v831_v32, %v768_v31  ;;  %v772_v51 = vpop.f32.mrf.mxu2 }
 0x1a4   : > { %v932_v52 = vadd.f32 %v931_v28, %v881_v46  ;;  %v1048_v12 = vsub.f32 %v1046_v53, %v1047_v63  ;;  %v1011_v28 = vsub.f32 %v3322_v5, %v3329_v19  ;;  %v773_v10 = vadd.f32 %v772_v51, %v714_v37 }
 0x1a6   : > { %v988_v58 = vand.u32 4294901760, %v932_v52  ;;  %v1049_v26 = vand.u32 4294901760, %v1048_v12  ;;  %v3352_v38 = vand.u32 4294901760, %v1011_v28 }
 0x1a8   : > { %v1040_v61 = vsub.f32 %v932_v52, %v988_v58  ;;  %989 = vmatpush.msrb.mxu2 %v988_v58  ;;  %1206 = vmatpush.msra.mxu1 %v988_v58  ;;  %v837_v40 = vpop.f32.mrf.mxu3 }
 0x1a9   : > { %v884_v43 = vpop.f32.mrf.mxu0  ;;  %v939_v17 = vpop.f32.mrf.mxu1 }
 0x1aa   : > { %v885_v62 = vadd.f32 %v884_v43, %v820_v60  ;;  %991 = vmatpush.msrb.mxu2 %v3299_v39  ;;  %1208 = vmatpush.msra.mxu1 %v3299_v39  ;;  %v1041_v2 = vand.u32 4294901760, %v1040_v61  ;;  %v777_v22 = vpop.f32.mrf.mxu2 }
 0x1ab   : > { %997 = vmatmul.f32.vlgmr.msrb.gmra.mxu2 %v3308_v59  ;;  %1210 = vmatmul.f32.vlgmr.msra.gmra.mxu1 %v3288_v23 }
 0x1ac   : > { %v936_v44 = vadd.f32 %v935_v56, %v885_v62  ;;  %1084 = vmatpush.msra.mxu2 %v1040_v61  ;;  %1169 = vmatpush.msra.mxu0 %v1041_v2  ;;  %v1042_v6 = vsub.f32 %v1040_v61, %v1041_v2  ;;  %v838_v61 = vadd.f32 %v837_v40, %v773_v10 }
 0x1ae   : > { %1087 = vmatpush.msra.mxu2 %v1046_v53  ;;  %1173 = vmatpush.msra.mxu0 %v1047_v63  ;;  %v1043_v16 = vand.u32 4294901760, %v1042_v6  ;;  %v3335_v25 = vand.u32 4294901760, %v936_v44  ;;  %v1019_v53 = vsub.f32 %v3342_v30, %v3355_v45 }
 0x1af   : > { %1175 = vmatmul.f32.vlgmr.msra.gmra.mxu0 %v3288_v23 }
 0x1b0   : > { %1044 = vmatpush.msrb.mxu3 %v1043_v16  ;;  %v1298_v8 = vsub.f32 %v936_v44, %v3335_v25  ;;  %v3368_v60 = vand.u32 4294901760, %v1019_v53  ;;  %v843_v24 = vpop.f32.mrf.mxu3 }
 0x1b1   : > { %v888_v50 = vpop.f32.mrf.mxu0  ;;  %v943_v48 = vpop.f32.mrf.mxu1 }
 0x1b2   : > { %v889_v27 = vadd.f32 %v888_v50, %v826_v21  ;;  %1050 = vmatpush.msrb.mxu3 %v1049_v26  ;;  %v1299_v46 = vand.u32 4294901760, %v1298_v8  ;;  %v722_v50 = vadd.f32 %v3283_v14, %v3285_v47  ;;  %v782_v28 = vpop.f32.mrf.mxu2 }
 0x1b3   : > { %1005 = vmatmul.f32.gmra.mxu2 %v3326_v18  ;;  %1052 = vmatmul.f32.vlgmr.msrb.gmra.mxu3 %v3288_v23 }
 0x1b4   : > { %v940_v7 = vadd.f32 %v939_v17, %v889_v27  ;;  %1124 = vmatpush.msra.mxu3 %v988_v58  ;;  %1214 = vmatmul.f32.gmra.mxu1 %v3297_v36  ;;  %v1300_v57 = vsub.f32 %v1298_v8, %v1299_v46  ;;  %v718_v27 = vadd.f32 %v3279_v11, %v3281_v13 }
 0x1b6   : > { %v3346_v33 = vand.u32 4294901760, %v940_v7  ;;  %1126 = vmatpush.msra.mxu3 %v3299_v39  ;;  %v1301_v43 = vand.u32 4294901760, %v1300_v57 }
 0x1b7   : > { %1179 = vmatmul.f32.gmra.mxu0 %v3297_v36 }
 0x1b8   : > { %v1292_v35 = vsub.f32 %v940_v7, %v3346_v33  ;;  %1241 = vmatpush.msrb.mxu2 %v3346_v33  ;;  %1376 = vmatpush.msrb.mxu1 %v3346_v33  ;;  %v783_v7 = vadd.f32 %v782_v28, %v722_v50 }
 0x1b9   : > { %v892_v39 = vpop.f32.mrf.mxu0  ;;  %v947_v2 = vpop.f32.mrf.mxu1 }
 0x1ba   : > { %v893_v52 = vadd.f32 %v892_v39, %v832_v54  ;;  %1243 = vmatpush.msrb.mxu2 %v3335_v25  ;;  %1336 = vmatpush.msrb.mxu0 %v1292_v35  ;;  %v1293_v9 = vand.u32 4294901760, %v1292_v35 }
 0x1bb   : > { %1378 = vmatpush.msrb.mxu1 %v3335_v25  ;;  %1013 = vmatmul.f32.gmra.mxu2 %v3352_v38 }
 0x1bc   : > { %v944_v55 = vadd.f32 %v943_v48, %v893_v52  ;;  %1056 = vmatmul.f32.gmra.mxu3 %v3297_v36  ;;  %1218 = vmatmul.f32.gmra.mxu1 %v3313_v41  ;;  %v1294_v56 = vsub.f32 %v1292_v35, %v1293_v9 }
 0x1bd   : > { %1339 = vmatpush.msrb.mxu0 %v1298_v8  ;;  %v778_v8 = vadd.f32 %v777_v22, %v718_v27 }
 0x1be   : > { %v1295_v58 = vand.u32 4294901760, %v1294_v56  ;;  %v3370_v63 = vand.u32 4294901760, %v944_v55 }
 0x1bf   : > { %1183 = vmatmul.f32.gmra.mxu0 %v3313_v41  ;;  %v844_v37 = vadd.f32 %v843_v24, %v778_v8 }
 0x1c0   : > { %1296 = vmatpush.msrb.mxu3 %v1295_v58  ;;  %v3374_v3 = vsub.f32 %v944_v55, %v3370_v63 }
 0x1c1   : > { %v896_v1 = vpop.f32.mrf.mxu0  ;;  %v951_v31 = vpop.f32.mrf.mxu1 }
 0x1c2   : > { %v897_v62 = vadd.f32 %v896_v1, %v838_v61  ;;  %1302 = vmatpush.msrb.mxu3 %v1301_v43  ;;  %v1551_v6 = vand.u32 4294901760, %v3374_v3 }
 0x1c3   : > { %1021 = vmatmul.f32.gmra.mxu2 %v3368_v60 }
 0x1c4   : > { %v948_v0 = vadd.f32 %v947_v2, %v897_v62  ;;  %1060 = vmatmul.f32.gmra.mxu3 %v3313_v41  ;;  %1222 = vmatmul.f32.gmra.mxu1 %v3331_v20  ;;  %v1552_v16 = vsub.f32 %v3374_v3, %v1551_v6 }
 0x1c6   : > { %v3378_v4 = vand.u32 4294901760, %v948_v0  ;;  %v1553_v21 = vand.u32 4294901760, %v1552_v16 }
 0x1c7   : > { %1187 = vmatmul.f32.gmra.mxu0 %v3331_v20 }
 0x1c8   : > { %v1544_v44 = vsub.f32 %v948_v0, %v3378_v4  ;;  %1493 = vmatpush.msra.mxu0 %v3378_v4 }
 0x1c9   : > { %v900_v26 = vpop.f32.mrf.mxu0  ;;  %v955_v13 = vpop.f32.mrf.mxu1 }
 0x1ca   : > { %1495 = vmatpush.msra.mxu0 %v3370_v63  ;;  %v1545_v12 = vand.u32 4294901760, %v1544_v44  ;;  %v901_v11 = vadd.f32 %v900_v26, %v844_v37 }
 0x1cb   : > { %1090 = vmatmul.f32.vlgmr.msra.gmra.mxu2 %v3291_v29 }
 0x1cc   : > { %1064 = vmatmul.f32.gmra.mxu3 %v3331_v20  ;;  %1382 = vmatmul.f32.vlgmr.msrb.gmra.mxu1 %v3295_v34  ;;  %v1546_v15 = vsub.f32 %v1544_v44, %v1545_v12  ;;  %v952_v54 = vadd.f32 %v951_v31, %v901_v11 }
 0x1cd   : > { %1421 = vmatpush.msra.mxu2 %v1293_v9 }
 0x1ce   : > { %v1547_v17 = vand.u32 4294901760, %v1546_v15 }
 0x1cf   : > { %1425 = vmatpush.msra.mxu2 %v1299_v46  ;;  %1342 = vmatmul.f32.vlgmr.msrb.gmra.mxu0 %v3291_v29  ;;  %v1746_v46 = vand.u32 4294901760, %v952_v54 }
 0x1d0   : > { %1673 = vmatpush.msrb.mxu0 %v1545_v12  ;;  %1548 = vmatpush.msra.mxu1 %v1547_v17 }
 0x1d1   : > { %v904_v32 = vpop.f32.mrf.mxu0  ;;  %v1802_v39 = vsub.f32 %v952_v54, %v1746_v46 }
 0x1d2   : > { %1677 = vmatpush.msrb.mxu0 %v1551_v6  ;;  %1554 = vmatpush.msra.mxu1 %v1553_v21 }
 0x1d3   : > { %1095 = vmatmul.f32.gmra.mxu2 %v3304_v49  ;;  %v1803_v52 = vand.u32 4294901760, %v1802_v39 }
 0x1d4   : > { %1710 = vmatpush.msrb.mxu1 %v3378_v4  ;;  %1130 = vmatmul.f32.vlgmr.msra.gmra.mxu3 %v3295_v34 }
 0x1d5   : > { %1388 = vmatmul.f32.gmra.mxu1 %v3311_v42  ;;  %1458 = vmatpush.msra.mxu3 %v3346_v33  ;;  %v1804_v10 = vsub.f32 %v1802_v39, %v1803_v52 }
 0x1d6   : > { %1712 = vmatpush.msrb.mxu1 %v3370_v63 }
 0x1d7   : > { %1460 = vmatpush.msra.mxu3 %v3335_v25  ;;  %1347 = vmatmul.f32.gmra.mxu0 %v3304_v49  ;;  %v849_v25 = vpop.f32.mrf.mxu3  ;;  %v1805_v55 = vand.u32 4294901760, %v1804_v10 }
 0x1d8   : > { %v850_v33 = vadd.f32 %v849_v25, %v783_v7 }
 0x1da   : > { %v905_v14 = vadd.f32 %v904_v32, %v850_v33 }
 0x1db   : > { %1100 = vmatmul.f32.gmra.mxu2 %v3322_v5 }
 0x1dc   : > { %1136 = vmatmul.f32.gmra.mxu3 %v3311_v42  ;;  %v956_v47 = vadd.f32 %v955_v13, %v905_v14 }
 0x1dd   : > { %1394 = vmatmul.f32.gmra.mxu1 %v3329_v19 }
 0x1de   : > { %v1744_v35 = vand.u32 4294901760, %v956_v47 }
 0x1df   : > { %1352 = vmatmul.f32.gmra.mxu0 %v3322_v5 }
 0x1e0   : > { %v1796_v48 = vsub.f32 %v956_v47, %v1744_v35 }
 0x1e2   : > { %v1797_v51 = vand.u32 4294901760, %v1796_v48 }
 0x1e3   : > { %1105 = vmatmul.f32.gmra.mxu2 %v3342_v30 }
 0x1e4   : > { %1142 = vmatmul.f32.gmra.mxu3 %v3329_v19  ;;  %v1798_v9 = vsub.f32 %v1796_v48, %v1797_v51 }
 0x1e5   : > { %1400 = vmatmul.f32.gmra.mxu1 %v3355_v45 }
 0x1e6   : > { %v1799_v53 = vand.u32 4294901760, %v1798_v9 }
 0x1e7   : > { %1357 = vmatmul.f32.gmra.mxu0 %v3342_v30 }
 0x1eb   : > { %1249 = vmatmul.f32.vlgmr.msrb.gmra.mxu2 %v3308_v59 }
 0x1ec   : > { %1148 = vmatmul.f32.gmra.mxu3 %v3355_v45  ;;  %1588 = vmatpush.msrb.mxu2 %v1544_v44 }
 0x1ed   : > { %1556 = vmatmul.f32.vlgmr.msra.gmra.mxu1 %v3288_v23 }
 0x1ee   : > { %1880 = vmatpush.msra.mxu1 %v1744_v35  ;;  %1591 = vmatpush.msrb.mxu2 %v3374_v3 }
 0x1ef   : > { %1501 = vmatmul.f32.vlgmr.msra.gmra.mxu0 %v3308_v59 }
 0x1f0   : > { %1882 = vmatpush.msra.mxu1 %v1746_v46  ;;  %1840 = vmatpush.msra.mxu0 %v1796_v48 }
 0x1f2   : > { %1843 = vmatpush.msra.mxu0 %v1802_v39 }
 0x1f3   : > { %1257 = vmatmul.f32.gmra.mxu2 %v3326_v18 }
 0x1f4   : > { %1304 = vmatmul.f32.vlgmr.msrb.gmra.mxu3 %v3288_v23 }
 0x1f5   : > { %1560 = vmatmul.f32.gmra.mxu1 %v3297_v36  ;;  %1628 = vmatpush.msrb.mxu3 %v3378_v4 }
 0x1f7   : > { %1630 = vmatpush.msrb.mxu3 %v3370_v63  ;;  %1509 = vmatmul.f32.gmra.mxu0 %v3326_v18 }
 0x1fb   : > { %1265 = vmatmul.f32.gmra.mxu2 %v3352_v38 }
 0x1fc   : > { %1308 = vmatmul.f32.gmra.mxu3 %v3297_v36 }
 0x1fd   : > { %1564 = vmatmul.f32.gmra.mxu1 %v3313_v41 }
 0x1ff   : > { %1517 = vmatmul.f32.gmra.mxu0 %v3352_v38 }
 0x203   : > { %1273 = vmatmul.f32.gmra.mxu2 %v3368_v60 }
 0x204   : > { %1312 = vmatmul.f32.gmra.mxu3 %v3313_v41 }
 0x205   : > { %1568 = vmatmul.f32.gmra.mxu1 %v3331_v20 }
 0x207   : > { %1525 = vmatmul.f32.gmra.mxu0 %v3368_v60 }
 0x20b   : > { %1427 = vmatmul.f32.vlgmr.msra.gmra.mxu2 %v3288_v23 }
 0x20c   : > { %1316 = vmatmul.f32.gmra.mxu3 %v3331_v20  ;;  %1745 = vmatpush.msra.mxu2 %v1744_v35 }
 0x20d   : > { %1714 = vmatmul.f32.vlgmr.msrb.gmra.mxu1 %v3288_v23 }
 0x20e   : > { %1747 = vmatpush.msra.mxu2 %v1746_v46 }
 0x20f   : > { %1679 = vmatmul.f32.vlgmr.msrb.gmra.mxu0 %v3288_v23 }
 0x213   : > { %1431 = vmatmul.f32.gmra.mxu2 %v3297_v36 }
 0x214   : > { %1462 = vmatmul.f32.vlgmr.msra.gmra.mxu3 %v3288_v23 }
 0x215   : > { %1800 = vmatpush.msra.mxu3 %v1799_v53  ;;  %1718 = vmatmul.f32.gmra.mxu1 %v3297_v36 }
 0x217   : > { %1806 = vmatpush.msra.mxu3 %v1805_v55  ;;  %1683 = vmatmul.f32.gmra.mxu0 %v3297_v36 }
 0x21b   : > { %1435 = vmatmul.f32.gmra.mxu2 %v3313_v41 }
 0x21c   : > { %1466 = vmatmul.f32.gmra.mxu3 %v3297_v36 }
 0x21d   : > { %1722 = vmatmul.f32.gmra.mxu1 %v3313_v41 }
 0x21f   : > { %1687 = vmatmul.f32.gmra.mxu0 %v3313_v41 }
 0x223   : > { %1439 = vmatmul.f32.gmra.mxu2 %v3331_v20 }
 0x224   : > { %1470 = vmatmul.f32.gmra.mxu3 %v3313_v41 }
 0x225   : > { %1726 = vmatmul.f32.gmra.mxu1 %v3331_v20 }
 0x227   : > { %1691 = vmatmul.f32.gmra.mxu0 %v3331_v20 }
 0x228   : > { %v1211_v63 = vpop.f32.mrf.mxu1 }
 0x22b   : > { %1594 = vmatmul.f32.vlgmr.msrb.gmra.mxu2 %v3291_v29 }
 0x22c   : > { %1474 = vmatmul.f32.gmra.mxu3 %v3331_v20  ;;  %1925 = vmatpush.msrb.mxu2 %v1797_v51  ;;  %v1176_v61 = vpop.f32.mrf.mxu0 }
 0x22d   : > { %1886 = vmatmul.f32.vlgmr.msra.gmra.mxu1 %v3295_v34 }
 0x22e   : > { %1929 = vmatpush.msrb.mxu2 %v1803_v52  ;;  %v998_v56 = vpop.f32.mrf.mxu2 }
 0x22f   : > { %1846 = vmatmul.f32.vlgmr.msra.gmra.mxu0 %v3291_v29 }
 0x231   : > { %v1215_v62 = vpop.f32.mrf.mxu1 }
 0x233   : > { %1599 = vmatmul.f32.gmra.mxu2 %v3304_v49 }
 0x234   : > { %1634 = vmatmul.f32.vlgmr.msrb.gmra.mxu3 %v3295_v34  ;;  %v1180_v1 = vpop.f32.mrf.mxu0 }
 0x235   : > { %1962 = vmatpush.msrb.mxu3 %v1744_v35  ;;  %1892 = vmatmul.f32.gmra.mxu1 %v3311_v42 }
 0x236   : > { %v1053_v57 = vpop.f32.mrf.mxu3  ;;  %v1006_v58 = vpop.f32.mrf.mxu2 }
 0x237   : > { %1964 = vmatpush.msrb.mxu3 %v1746_v46  ;;  %v1054_v40 = vadd.f32 %v1053_v57, %v998_v56  ;;  %1851 = vmatmul.f32.gmra.mxu0 %v3304_v49 }
 0x239   : > { %v1219_v0 = vpop.f32.mrf.mxu1 }
 0x23b   : > { %1604 = vmatmul.f32.gmra.mxu2 %v3322_v5 }
 0x23c   : > { %1640 = vmatmul.f32.gmra.mxu3 %v3311_v42  ;;  %v1184_v42 = vpop.f32.mrf.mxu0 }
 0x23d   : > { %1898 = vmatmul.f32.gmra.mxu1 %v3329_v19 }
 0x23e   : > { %v1014_v29 = vpop.f32.mrf.mxu2 }
 0x23f   : > { %v1057_v43 = vpop.f32.mrf.mxu3  ;;  %1856 = vmatmul.f32.gmra.mxu0 %v3322_v5 }
 0x240   : > { %v1058_v34 = vadd.f32 %v1057_v43, %v1006_v58 }
 0x241   : > { %v1223_v12 = vpop.f32.mrf.mxu1 }
 0x243   : > { %1609 = vmatmul.f32.gmra.mxu2 %v3342_v30 }
 0x244   : > { %1646 = vmatmul.f32.gmra.mxu3 %v3329_v19  ;;  %v1188_v19 = vpop.f32.mrf.mxu0 }
 0x245   : > { %1904 = vmatmul.f32.gmra.mxu1 %v3355_v45 }
 0x246   : > { %v1022_v49 = vpop.f32.mrf.mxu2 }
 0x247   : > { %v1061_v2 = vpop.f32.mrf.mxu3  ;;  %1861 = vmatmul.f32.gmra.mxu0 %v3342_v30 }
 0x248   : > { %v1062_v3 = vadd.f32 %v1061_v2, %v1014_v29 }
 0x249   : > { %v1383_v22 = vpop.f32.mrf.mxu1 }
 0x24b   : > { %1753 = vmatmul.f32.vlgmr.msra.gmra.mxu2 %v3308_v59 }
 0x24c   : > { %1652 = vmatmul.f32.gmra.mxu3 %v3355_v45  ;;  %v1343_v45 = vpop.f32.mrf.mxu0 }
 0x24e   : > { %v1091_v5 = vpop.f32.mrf.mxu2 }
 0x24f   : > { %v1065_v4 = vpop.f32.mrf.mxu3  ;;  %v1092_v44 = vadd.f32 %v1091_v5, %v1054_v40 }
 0x250   : > { %v1066_v6 = vadd.f32 %v1065_v4, %v1022_v49 }
 0x252   : > { %v1389_v31 = vpop.f32.mrf.mxu1 }
 0x253   : > { %1761 = vmatmul.f32.gmra.mxu2 %v3326_v18 }
 0x254   : > { %1808 = vmatmul.f32.vlgmr.msra.gmra.mxu3 %v3288_v23  ;;  %v1348_v28 = vpop.f32.mrf.mxu0 }
 0x256   : > { %v1096_v15 = vpop.f32.mrf.mxu2 }
 0x257   : > { %v1131_v16 = vpop.f32.mrf.mxu3  ;;  %v1097_v17 = vadd.f32 %v1096_v15, %v1058_v34  ;;  %v3545_v15 = vstv %s3493_s18  ;;  %s2590_s18 = sld [smem:[#allocation6 + $0x202]] }
 0x258   : > { %v1132_v30 = vadd.f32 %v1131_v16, %v1092_v44 }
 0x25a   : > { %v1177_v21 = vadd.f32 %v1176_v61, %v1132_v30  ;;  %v1395_v14 = vpop.f32.mrf.mxu1  ;;  %v3553_v30 = vstv %s3501_s16  ;;  %s2608_s16 = sld [smem:[#allocation6 + $0x302]] }
 0x25b   : > { %1769 = vmatmul.f32.gmra.mxu2 %v3352_v38 }
 0x25c   : > { %v3466_v59 = vadd.f32 %v1211_v63, %v1177_v21  ;;  %1812 = vmatmul.f32.gmra.mxu3 %v3297_v36  ;;  %v1353_v37 = vpop.f32.mrf.mxu0  ;;  %v3556_v21 = vstv %s3503_s15  ;;  %s2617_s15 = sld [smem:[#allocation6 + $0x382]] }
 0x25e   : > { %v1101_v24 = vpop.f32.mrf.mxu2  ;;  %vm1984_vm8 = vcmp.lt.f32.partialorder %v3466_v59, 0.0 }
 0x25f   : > { %v1137_v26 = vpop.f32.mrf.mxu3  ;;  %v1102_v18 = vadd.f32 %v1101_v24, %v1062_v3 }
 0x260   : > { %v1138_v50 = vadd.f32 %v1137_v26, %v1097_v17  ;;  %v3550_v17 = vstv %s3495_s1  ;;  %s2599_s1 = sld [smem:[#allocation6 + $0x282]] }
 0x262   : > { %v1181_v27 = vadd.f32 %v1180_v1, %v1138_v50  ;;  %v1401_v46 = vpop.f32.mrf.mxu1  ;;  %v3515_v1 = vstv %s1982_s13  ;;  %s3527_s13 = sld [smem:[#allocation6 + $0x201]] }
 0x263   : > { %1777 = vmatmul.f32.gmra.mxu2 %v3368_v60 }
 0x264   : > { %1816 = vmatmul.f32.gmra.mxu3 %v3313_v41  ;;  %v3471_v7 = vadd.f32 %v1215_v62, %v1181_v27  ;;  %v1358_v35 = vpop.f32.mrf.mxu0  ;;  %v3517_v62 = vstv %s2557_s14  ;;  %s3529_s14 = sld [smem:[#allocation6 + $0x281]] }
 0x266   : > { %v1106_v38 = vpop.f32.mrf.mxu2  ;;  %vm1985_vm9 = vcmp.lt.f32.partialorder %v3471_v7, 0.0 }
 0x267   : > { %v1143_v8 = vpop.f32.mrf.mxu3  ;;  %v1107_v25 = vadd.f32 %v1106_v38, %v1066_v6 }
 0x268   : > { %v1144_v32 = vadd.f32 %v1143_v8, %v1102_v18 }
 0x26a   : > { %v1185_v33 = vadd.f32 %v1184_v42, %v1144_v32  ;;  %v3485_v56 = vpop.f32.mrf.mxu1  ;;  %v2003_v32 = vsel %vm1985_vm9, %v3515_v1, %v3517_v62 }
 0x26b   : > { %1931 = vmatmul.f32.vlgmr.msrb.gmra.mxu2 %v3288_v23 }
 0x26c   : > { %1820 = vmatmul.f32.gmra.mxu3 %v3331_v20  ;;  %v3475_v11 = vadd.f32 %v1219_v0, %v1185_v33  ;;  %v3483_v10 = vpop.f32.mrf.mxu0  ;;  %v3575_v33 = vstv %s3512_s21  ;;  %s3892_s21 = sld [smem:[#allocation8]] }
 0x26e   : > { %v1250_v60 = vpop.f32.mrf.mxu2  ;;  %vm1986_vm11 = vcmp.lt.f32.partialorder %v3475_v11, 0.0 }
 0x26f   : > { %v1149_v13 = vpop.f32.mrf.mxu3 }
 0x270   : > { %v1150_v47 = vadd.f32 %v1149_v13, %v1107_v25  ;;  %v3586_v13 = vstv %s3523_s10  ;;  %s3901_s10 = sld [smem:[#allocation8 + $0x1]] }
 0x272   : > { %v1189_v54 = vadd.f32 %v1188_v19, %v1150_v47  ;;  %v3499_v43 = vpop.f32.mrf.mxu1  ;;  %v3539_v19 = vstv %s3489_s17  ;;  %v3589_v47 = vstv %s3527_s13  ;;  %s2572_s17 = sld [smem:[#allocation6 + $0x102]] }
 0x273   : > { %1935 = vmatmul.f32.gmra.mxu2 %v3297_v36  ;;  %s3903_s13 = sld [smem:[#allocation8 + $0x2]] }
 0x274   : > { %1966 = vmatmul.f32.vlgmr.msrb.gmra.mxu3 %v3288_v23  ;;  %v3479_v48 = vadd.f32 %v1223_v12, %v1189_v54  ;;  %v3497_v29 = vpop.f32.mrf.mxu0  ;;  %v3542_v12 = vstv %s3491_s20  ;;  %s2581_s20 = sld [smem:[#allocation6 + $0x182]] }
 0x276   : > { %v1258_v39 = vpop.f32.mrf.mxu2  ;;  %vm1987_vm13 = vcmp.lt.f32.partialorder %v3479_v48, 0.0 }
 0x277   : > { %v1305_v51 = vpop.f32.mrf.mxu3 }
 0x278   : > { %v1306_v52 = vadd.f32 %v1305_v51, %v1250_v60  ;;  %v3583_v60 = vstv %s3521_s11  ;;  %s3899_s11 = sld [smem:[#allocation6 + $0x183]] }
 0x27a   : > { %v1344_v9 = vadd.f32 %v1343_v45, %v1306_v52  ;;  %v1565_v4 = vpop.f32.mrf.mxu1  ;;  %v3559_v45 = vstv %s3505_s22  ;;  %s3888_s22 = sld [smem:[#allocation6 + $0x3]] }
 0x27b   : > { %1939 = vmatmul.f32.gmra.mxu2 %v3313_v41 }
 0x27c   : > { %1970 = vmatmul.f32.gmra.mxu3 %v3297_v36  ;;  %v1384_v53 = vadd.f32 %v1383_v22, %v1344_v9  ;;  %v1518_v5 = vpop.f32.mrf.mxu0  ;;  %v3562_v22 = vstv %s3507_s23  ;;  %s3890_s23 = sld [smem:[#allocation6 + $0x83]] }
 0x27d   : > { %v3547_v16 = vadd.f32 %v1565_v4, %v1518_v5 }
 0x27e   : > { %v1266_v55 = vpop.f32.mrf.mxu2 }
 0x27f   : > { %v1309_v57 = vpop.f32.mrf.mxu3 }
 0x280   : > { %v1310_v23 = vadd.f32 %v1309_v57, %v1258_v39  ;;  %v3598_v39 = vstv %s3536_s3  ;;  %s2563_s3 = sld [smem:[#allocation6 + $0x82]] }
 0x282   : > { %v1349_v58 = vadd.f32 %v1348_v28, %v1310_v23  ;;  %v1569_v52 = vpop.f32.mrf.mxu1 }
 0x283   : > { %1943 = vmatmul.f32.gmra.mxu2 %v3331_v20 }
 0x284   : > { %v1390_v40 = vadd.f32 %v1389_v31, %v1349_v58  ;;  %1974 = vmatmul.f32.gmra.mxu3 %v3313_v41  ;;  %v1526_v51 = vpop.f32.mrf.mxu0 }
 0x286   : > { %v1274_v36 = vpop.f32.mrf.mxu2 }
 0x287   : > { %v1313_v61 = vpop.f32.mrf.mxu3 }
 0x288   : > { %v1314_v63 = vadd.f32 %v1313_v61, %v1266_v55  ;;  %v3603_v55 = vadd.f32 %v1569_v52, %v1526_v51 }
 0x28a   : > { %v1354_v41 = vadd.f32 %v1353_v37, %v1314_v63  ;;  %v3578_v37 = vstv %s3519_s26  ;;  %s3896_s26 = sld [smem:[#allocation6 + $0x103]] }
 0x28c   : > { %v3509_v34 = vadd.f32 %v1395_v14, %v1354_v41  ;;  %1978 = vmatmul.f32.gmra.mxu3 %v3331_v20  ;;  %v2002_v20 = vsel %vm1984_vm8, %v3515_v1, %v3517_v62 }
 0x28d   : > { %v2018_v44 = vmul.f32 %v2002_v20, %v3466_v59 }
 0x28e   : > { %v1428_v49 = vpop.f32.mrf.mxu2 }
 0x28f   : > { %v1317_v2 = vpop.f32.mrf.mxu3  ;;  %v1429_v3 = vadd.f32 %v1428_v49, %v1384_v53  ;;  %v2036_v18 = vmul.f32 %v3539_v19, %v2018_v44  ;;  %v2083_v50 = vmul.f32 %v3542_v12, %v2018_v44  ;;  %v2130_v27 = vmul.f32 %v3545_v15, %v2018_v44 }
 0x290   : > { %v1318_v42 = vadd.f32 %v1317_v2, %v1274_v36  ;;  %v2177_v31 = vmul.f32 %v3550_v17, %v2018_v44  ;;  %v2224_v38 = vmul.f32 %v3553_v30, %v2018_v44  ;;  %v2271_v8 = vmul.f32 %v3556_v21, %v2018_v44 }
 0x291   : > { %v2318_v25 = vmul.f32 %v3559_v45, %v2018_v44  ;;  %v2365_v9 = vmul.f32 %v3562_v22, %v2018_v44  ;;  %v2019_v53 = vmul.f32 %v2003_v32, %v3471_v7 }
 0x292   : > { %v1359_v0 = vadd.f32 %v1358_v35, %v1318_v42  ;;  %v3592_v35 = vstv %s3529_s14  ;;  %s3907_s14 = sld [smem:[#allocation8 + $0x3]] }
 0x294   : > { %v3534_v6 = vadd.f32 %v1401_v46, %v1359_v0  ;;  %v3595_v46 = vstv %s3531_s2  ;;  %s2559_s2 = sld [smem:[#allocation6 + $0x2]] }
 0x296   : > { %v1432_v59 = vpop.f32.mrf.mxu2 }
 0x297   : > { %v1463_v24 = vpop.f32.mrf.mxu3  ;;  %v1433_v26 = vadd.f32 %v1432_v59, %v1390_v40 }
 0x298   : > { %v1464_v28 = vadd.f32 %v1463_v24, %v1429_v3 }
 0x29a   : > { %vm1988_vm10 = vcmp.lt.f32.partialorder %v1464_v28, 0.0 }
 0x29b   : > { %v2006_v14 = vsel %vm1988_vm10, %v3515_v1, %v3517_v62 }
 0x29c   : > { %v2022_v54 = vmul.f32 %v2006_v14, %v1464_v28  ;;  %v2131_v28 = vmul.f32 %v3545_v15, %v2019_v53  ;;  %v2366_v14 = vmul.f32 %v3562_v22, %v2019_v53 }
 0x29e   : > { %v2042_v57 = vmul.f32 %v3575_v33, %v2022_v54  ;;  %v2089_v23 = vmul.f32 %v3578_v37, %v2022_v54  ;;  %v2136_v58 = vmul.f32 %v3583_v60, %v2022_v54  ;;  %v2183_v40 = vmul.f32 %v3586_v13, %v2022_v54  ;;  %v1436_v36 = vpop.f32.mrf.mxu2 }
 0x29f   : > { %v2230_v61 = vmul.f32 %v3589_v47, %v2022_v54  ;;  %v2277_v63 = vmul.f32 %v3592_v35, %v2022_v54  ;;  %v2324_v41 = vmul.f32 %v3595_v46, %v2022_v54  ;;  %v2371_v7 = vmul.f32 %v3598_v39, %v2022_v54  ;;  %v1467_v49 = vpop.f32.mrf.mxu3 }
 0x2a0   : > { %v3613_v2 = vadd.f32 %v2042_v57, %v2036_v18  ;;  %v3615_v3 = vadd.f32 %v2089_v23, %v2083_v50  ;;  %v3617_v42 = vadd.f32 %v2136_v58, %v2130_v27  ;;  %v3619_v20 = vadd.f32 %v2183_v40, %v2177_v31 }
 0x2a1   : > { %v3621_v0 = vadd.f32 %v2230_v61, %v2224_v38  ;;  %v3623_v5 = vadd.f32 %v2277_v63, %v2271_v8  ;;  %v3625_v4 = vadd.f32 %v2324_v41, %v2318_v25  ;;  %v3627_v44 = vadd.f32 %v2371_v7, %v2365_v9 }
 0x2a2   : > { %4217 = vst [vmem:[#allocation18_spill] sm:$0xff] %v3617_v42  ;;  %v1468_v59 = vadd.f32 %v1467_v49, %v1433_v26  ;;  %v1437_v24 = vadd.f32 %v1436_v36, %v3509_v34  ;;  %v2037_v18 = vmul.f32 %v3539_v19, %v2019_v53  ;;  %v2004_v50 = vsel %vm1986_vm11, %v3515_v1, %v3517_v62 }
 0x2a3   : > { %4218 = vst [vmem:[#allocation19_spill] sm:$0xff] %v3619_v20  ;;  %v2084_v27 = vmul.f32 %v3542_v12, %v2019_v53  ;;  %v2178_v31 = vmul.f32 %v3550_v17, %v2019_v53  ;;  %v2225_v26 = vmul.f32 %v3553_v30, %v2019_v53  ;;  %v2272_v34 = vmul.f32 %v3556_v21, %v2019_v53 }
 0x2a4   : > { %4219 = vst [vmem:[#allocation20_spill] sm:$0xff] %v3621_v0  ;;  %vm1989_vm12 = vcmp.lt.f32.partialorder %v1468_v59, 0.0  ;;  %v2319_v8 = vmul.f32 %v3559_v45, %v2019_v53  ;;  %v2020_v54 = vmul.f32 %v2004_v50, %v3475_v11 }
 0x2a5   : > { %4220 = vst [vmem:[#allocation21_spill] sm:$0xff] %v3623_v5  ;;  %v2007_v38 = vsel %vm1989_vm12, %v3515_v1, %v3517_v62 }
 0x2a6   : > { %4221 = vst [vmem:[#allocation22_spill] sm:$0xff] %v3625_v4  ;;  %v2023_v25 = vmul.f32 %v2007_v38, %v1468_v59  ;;  %v1440_v32 = vpop.f32.mrf.mxu2 }
 0x2a7   : > { %4222 = vst [vmem:[#allocation23_spill] sm:$0xff] %v3627_v44  ;;  %v1471_v51 = vpop.f32.mrf.mxu3  ;;  %v1441_v52 = vadd.f32 %v1440_v32, %v3534_v6 }
 0x2a8   : > { %v2043_v9 = vmul.f32 %v3575_v33, %v2023_v25  ;;  %v2090_v57 = vmul.f32 %v3578_v37, %v2023_v25  ;;  %v2137_v23 = vmul.f32 %v3583_v60, %v2023_v25  ;;  %v2184_v58 = vmul.f32 %v3586_v13, %v2023_v25 }
 0x2a9   : > { %v2231_v40 = vmul.f32 %v3589_v47, %v2023_v25  ;;  %v2278_v36 = vmul.f32 %v3592_v35, %v2023_v25  ;;  %v2325_v53 = vmul.f32 %v3595_v46, %v2023_v25  ;;  %v2372_v11 = vmul.f32 %v3598_v39, %v2023_v25 }
 0x2aa   : > { %v3655_v61 = vadd.f32 %v2043_v9, %v2037_v18  ;;  %v3657_v63 = vadd.f32 %v2090_v57, %v2084_v27  ;;  %v3659_v6 = vadd.f32 %v2137_v23, %v2131_v28  ;;  %v3661_v41 = vadd.f32 %v2184_v58, %v2178_v31 }
 0x2ab   : > { %v3663_v7 = vadd.f32 %v2231_v40, %v2225_v26  ;;  %v3665_v49 = vadd.f32 %v2278_v36, %v2272_v34  ;;  %v3667_v59 = vadd.f32 %v2325_v53, %v2319_v8  ;;  %v3669_v50 = vadd.f32 %v2372_v11, %v2366_v14 }
 0x2ac   : > { %v1472_v38 = vadd.f32 %v1471_v51, %v1437_v24  ;;  %v2005_v18 = vsel %vm1987_vm13, %v3515_v1, %v3517_v62  ;;  %v2038_v28 = vmul.f32 %v3539_v19, %v2020_v54  ;;  %v2085_v31 = vmul.f32 %v3542_v12, %v2020_v54 }
 0x2ad   : > { %v2132_v26 = vmul.f32 %v3545_v15, %v2020_v54  ;;  %v2179_v24 = vmul.f32 %v3550_v17, %v2020_v54  ;;  %v2226_v25 = vmul.f32 %v3553_v30, %v2020_v54  ;;  %v2273_v51 = vmul.f32 %v3556_v21, %v2020_v54 }
 0x2ae   : > { %vm1990_vm14 = vcmp.lt.f32.partialorder %v1472_v38, 0.0  ;;  %v3675_v27 = vpop.f32.mrf.mxu2  ;;  %v2320_v9 = vmul.f32 %v3559_v45, %v2020_v54  ;;  %v2367_v57 = vmul.f32 %v3562_v22, %v2020_v54  ;;  %v2021_v23 = vmul.f32 %v2005_v18, %v3479_v48 }
 0x2af   : > { %v2008_v34 = vsel %vm1990_vm14, %v3515_v1, %v3517_v62  ;;  %v1475_v8 = vpop.f32.mrf.mxu3 }
 0x2b0   : > { %v2024_v32 = vmul.f32 %v2008_v34, %v1472_v38  ;;  %v1476_v14 = vadd.f32 %v1475_v8, %v1441_v52  ;;  %v3696_v8 = vpop.f32.mrf.mxu0 }
 0x2b2   : > { %v2044_v58 = vmul.f32 %v3575_v33, %v2024_v32  ;;  %v2091_v40 = vmul.f32 %v3578_v37, %v2024_v32  ;;  %v2138_v36 = vmul.f32 %v3583_v60, %v2024_v32  ;;  %v2185_v53 = vmul.f32 %v3586_v13, %v2024_v32 }
 0x2b3   : > { %v2232_v11 = vmul.f32 %v3589_v47, %v2024_v32  ;;  %v2279_v52 = vmul.f32 %v3592_v35, %v2024_v32  ;;  %v2326_v38 = vmul.f32 %v3595_v46, %v2024_v32  ;;  %v2373_v34 = vmul.f32 %v3598_v39, %v2024_v32  ;;  %v3714_v32 = vpop.f32.mrf.mxu1 }
 0x2b4   : > { %v3698_v54 = vadd.f32 %v2044_v58, %v2038_v28  ;;  %v3700_v48 = vadd.f32 %v2091_v40, %v2085_v31  ;;  %v3702_v18 = vadd.f32 %v2138_v36, %v2132_v26  ;;  %v3704_v44 = vadd.f32 %v2185_v53, %v2179_v24 }
 0x2b5   : > { %v3706_v4 = vadd.f32 %v2232_v11, %v2226_v25  ;;  %v3708_v5 = vadd.f32 %v2279_v52, %v2273_v51  ;;  %v3710_v0 = vadd.f32 %v2326_v38, %v2320_v9  ;;  %v3712_v20 = vadd.f32 %v2373_v34, %v2367_v57 }
 0x2b6   : > { %vm1991_vm15 = vcmp.lt.f32.partialorder %v1476_v14, 0.0  ;;  %v1600_v42 = vpop.f32.mrf.mxu2  ;;  %v2039_v28 = vmul.f32 %v3539_v19, %v2021_v23  ;;  %v2086_v31 = vmul.f32 %v3542_v12, %v2021_v23  ;;  %v2133_v25 = vmul.f32 %v3545_v15, %v2021_v23 }
 0x2b7   : > { %v2009_v26 = vsel %vm1991_vm15, %v3515_v1, %v3517_v62  ;;  %v3720_v24 = vpop.f32.mrf.mxu3  ;;  %v2180_v51 = vmul.f32 %v3550_v17, %v2021_v23  ;;  %v2227_v9 = vmul.f32 %v3553_v30, %v2021_v23  ;;  %v2274_v58 = vmul.f32 %v3556_v21, %v2021_v23 }
 0x2b8   : > { %v2025_v57 = vmul.f32 %v2009_v26, %v1476_v14  ;;  %v2321_v40 = vmul.f32 %v3559_v45, %v2021_v23  ;;  %v2368_v19 = vmul.f32 %v3562_v22, %v2021_v23  ;;  %v1562_v12 = vadd.f32 %v3499_v43, %v3497_v29 }
 0x2ba   : > { %v2045_v36 = vmul.f32 %v3575_v33, %v2025_v57  ;;  %v2092_v53 = vmul.f32 %v3578_v37, %v2025_v57  ;;  %v2139_v15 = vmul.f32 %v3583_v60, %v2025_v57  ;;  %v2186_v17 = vmul.f32 %v3586_v13, %v2025_v57 }
 0x2bb   : > { %v2233_v30 = vmul.f32 %v3589_v47, %v2025_v57  ;;  %v2280_v14 = vmul.f32 %v3592_v35, %v2025_v57  ;;  %v2327_v21 = vmul.f32 %v3595_v46, %v2025_v57  ;;  %v2374_v45 = vmul.f32 %v3598_v39, %v2025_v57  ;;  %v1684_v47 = vpop.f32.mrf.mxu0  ;;  %v1719_v38 = vpop.f32.mrf.mxu1 }
 0x2bc   : > { %v3738_v22 = vadd.f32 %v2045_v36, %v2039_v28  ;;  %v3740_v23 = vadd.f32 %v2092_v53, %v2086_v31  ;;  %v3742_v29 = vadd.f32 %v2139_v15, %v2133_v25  ;;  %v3744_v43 = vadd.f32 %v2186_v17, %v2180_v51 }
 0x2bd   : > { %v3746_v33 = vadd.f32 %v2233_v30, %v2227_v9  ;;  %v3748_v37 = vadd.f32 %v2280_v14, %v2274_v58  ;;  %v3750_v60 = vadd.f32 %v2327_v21, %v2321_v40  ;;  %v3752_v13 = vadd.f32 %v2374_v45, %v2368_v19 }
 0x2be   : > { %v1601_v35 = vadd.f32 %v1600_v42, %v1562_v12  ;;  %v1605_v46 = vpop.f32.mrf.mxu2  ;;  %v3758_v57 = vstv %s2559_s2  ;;  %v3760_v58 = vstv %s2563_s3  ;;  %v3764_v19 = vstv %s2572_s17  ;;  %s3909_s2 = sld [smem:[#allocation6 + $0x203]] }
 0x2bf   : > { %v1641_v39 = vpop.f32.mrf.mxu3  ;;  %v1606_v11 = vadd.f32 %v1605_v46, %v3547_v16  ;;  %v1558_v16 = vadd.f32 %v3485_v56, %v3483_v10  ;;  %v3766_v12 = vstv %s2581_s20  ;;  %v3768_v36 = vstv %s2590_s18  ;;  %s3911_s3 = sld [smem:[#allocation8 + $0x4]] }
 0x2c0   : > { %v1642_v52 = vadd.f32 %v1641_v39, %v1601_v35  ;;  %v3770_v15 = vstv %s2599_s1  ;;  %v3774_v17 = vstv %s2617_s15  ;;  %s3916_s17 = sld [smem:[#allocation6 + $0x283]] }
 0x2c1   : > { %s3922_s20 = sld [smem:[#allocation6 + $0x303]] }
 0x2c2   : > { %v1685_v34 = vadd.f32 %v1684_v47, %v1642_v52  ;;  %s3925_s18 = sld [smem:[#allocation6 + $0x383]] }
 0x2c3   : > { %v1688_v25 = vpop.f32.mrf.mxu0  ;;  %v1723_v51 = vpop.f32.mrf.mxu1  ;;  %s3928_s1 = sld [smem:[#allocation8 + $0x5]] }
 0x2c4   : > { %v1720_v28 = vadd.f32 %v1719_v38, %v1685_v34  ;;  %s3979_s15 = sld [smem:[#allocation8 + $0x7]] }
 0x2c6   : > { %v1610_v31 = vpop.f32.mrf.mxu2  ;;  %vm1993_vm0 = vcmp.lt.f32.partialorder %v1720_v28, 0.0 }
 0x2c7   : > { %v1647_v26 = vpop.f32.mrf.mxu3  ;;  %v1611_v9 = vadd.f32 %v1610_v31, %v3603_v55  ;;  %v2011_v40 = vsel %vm1993_vm0, %v3515_v1, %v3517_v62  ;;  %v3772_v55 = vstv %s2608_s16  ;;  %s3968_s16 = sld [smem:[#allocation8 + $0x6]] }
 0x2c8   : > { %v1648_v42 = vadd.f32 %v1647_v26, %v1606_v11  ;;  %v2027_v53 = vmul.f32 %v2011_v40, %v1720_v28 }
 0x2ca   : > { %v1689_v10 = vadd.f32 %v1688_v25, %v1648_v42  ;;  %v2053_v56 = vmul.f32 %v3758_v57, %v2027_v53  ;;  %v2100_v30 = vmul.f32 %v3760_v58, %v2027_v53  ;;  %v2147_v14 = vmul.f32 %v3764_v19, %v2027_v53 }
 0x2cb   : > { %v2194_v21 = vmul.f32 %v3766_v12, %v2027_v53  ;;  %v2241_v47 = vmul.f32 %v3768_v36, %v2027_v53  ;;  %v2288_v35 = vmul.f32 %v3770_v15, %v2027_v53  ;;  %v2335_v46 = vmul.f32 %v3772_v55, %v2027_v53 }
 0x2cc   : > { %v2382_v39 = vmul.f32 %v3774_v17, %v2027_v53  ;;  %v3787_v52 = vadd.f32 %v2053_v56, %v3655_v61  ;;  %v3790_v38 = vadd.f32 %v2100_v30, %v3657_v63  ;;  %v3793_v34 = vadd.f32 %v2147_v14, %v3659_v6  ;;  %v1692_v63 = vpop.f32.mrf.mxu0  ;;  %v1727_v53 = vpop.f32.mrf.mxu1 }
 0x2cd   : > { %v3796_v28 = vadd.f32 %v2194_v21, %v3661_v41  ;;  %v3799_v31 = vadd.f32 %v2241_v47, %v3663_v7  ;;  %v3802_v26 = vadd.f32 %v2288_v35, %v3665_v49  ;;  %v3805_v25 = vadd.f32 %v2335_v46, %v3667_v59 }
 0x2ce   : > { %v3780_v45 = vpop.f32.mrf.mxu2  ;;  %v3808_v61 = vadd.f32 %v2382_v39, %v3669_v50  ;;  %v1724_v42 = vadd.f32 %v1723_v51, %v1689_v10  ;;  %v1596_v41 = vadd.f32 %v3675_v27, %v1558_v16 }
 0x2cf   : > { %v1653_v11 = vpop.f32.mrf.mxu3 }
 0x2d0   : > { %v1654_v40 = vadd.f32 %v1653_v11, %v1611_v9  ;;  %vm1994_vm1 = vcmp.lt.f32.partialorder %v1724_v42, 0.0  ;;  %v1636_v59 = vadd.f32 %v3720_v24, %v1596_v41 }
 0x2d1   : > { %v2012_v7 = vsel %vm1994_vm1, %v3515_v1, %v3517_v62 }
 0x2d2   : > { %v1693_v6 = vadd.f32 %v1692_v63, %v1654_v40  ;;  %v2028_v56 = vmul.f32 %v2012_v7, %v1724_v42 }
 0x2d4   : > { %v1728_v30 = vadd.f32 %v1727_v53, %v1693_v6  ;;  %v2054_v50 = vmul.f32 %v3758_v57, %v2028_v56  ;;  %v2101_v51 = vmul.f32 %v3760_v58, %v2028_v56  ;;  %v2148_v9 = vmul.f32 %v3764_v19, %v2028_v56 }
 0x2d5   : > { %v2195_v10 = vmul.f32 %v3766_v12, %v2028_v56  ;;  %v2242_v27 = vmul.f32 %v3768_v36, %v2028_v56  ;;  %v2289_v16 = vmul.f32 %v3770_v15, %v2028_v56  ;;  %v2336_v21 = vmul.f32 %v3772_v55, %v2028_v56 }
 0x2d6   : > { %v3813_v49 = vpop.f32.mrf.mxu2  ;;  %v2383_v47 = vmul.f32 %v3774_v17, %v2028_v56  ;;  %v3825_v24 = vadd.f32 %v2054_v50, %v3698_v54  ;;  %v3828_v35 = vadd.f32 %v2101_v51, %v3700_v48  ;;  %v3831_v46 = vadd.f32 %v2148_v9, %v3702_v18 }
 0x2d7   : > { %v1809_v14 = vpop.f32.mrf.mxu3  ;;  %v3834_v39 = vadd.f32 %v2195_v10, %v3704_v44  ;;  %v3837_v11 = vadd.f32 %v2242_v27, %v3706_v4  ;;  %v3840_v63 = vadd.f32 %v2289_v16, %v3708_v5  ;;  %v3843_v42 = vadd.f32 %v2336_v21, %v3710_v0  ;;  %v1847_v27 = vpop.f32.mrf.mxu0 }
 0x2d8   : > { %v3846_v54 = vadd.f32 %v2383_v47, %v3712_v20  ;;  %vm1995_vm2 = vcmp.lt.f32.partialorder %v1728_v30, 0.0  ;;  %v1681_v44 = vadd.f32 %v3696_v8, %v1636_v59 }
 0x2d9   : > { %4223 = vst [vmem:[#allocation24_spill] sm:$0xff] %v3834_v39  ;;  %v2013_v48 = vsel %vm1995_vm2, %v3515_v1, %v3517_v62 }
 0x2da   : > { %4224 = vst [vmem:[#allocation25_spill] sm:$0xff] %v3837_v11  ;;  %v2029_v18 = vmul.f32 %v2013_v48, %v1728_v30 }
 0x2db   : > { %4225 = vst [vmem:[#allocation26_spill] sm:$0xff] %v3840_v63 }
 0x2dc   : > { %4226 = vst [vmem:[#allocation27_spill] sm:$0xff] %v3843_v42  ;;  %v2055_v6 = vmul.f32 %v3758_v57, %v2029_v18  ;;  %v2102_v5 = vmul.f32 %v3760_v58, %v2029_v18  ;;  %v2149_v0 = vmul.f32 %v3764_v19, %v2029_v18  ;;  %v2196_v53 = vmul.f32 %v3766_v12, %v2029_v18 }
 0x2dd   : > { %4227 = vst [vmem:[#allocation28_spill] sm:$0xff] %v3846_v54  ;;  %v2243_v20 = vmul.f32 %v3768_v36, %v2029_v18  ;;  %v2290_v41 = vmul.f32 %v3770_v15, %v2029_v18  ;;  %v2337_v7 = vmul.f32 %v3772_v55, %v2029_v18  ;;  %v2384_v56 = vmul.f32 %v3774_v17, %v2029_v18 }
 0x2de   : > { %v3850_v40 = vpop.f32.mrf.mxu2  ;;  %v3862_v30 = vadd.f32 %v2055_v6, %v3738_v22  ;;  %v3865_v8 = vadd.f32 %v2102_v5, %v3740_v23  ;;  %v3868_v59 = vadd.f32 %v2149_v0, %v3742_v29  ;;  %v3871_v50 = vadd.f32 %v2196_v53, %v3744_v43  ;;  %v1887_v43 = vpop.f32.mrf.mxu1 }
 0x2df   : > { %v1813_v4 = vpop.f32.mrf.mxu3  ;;  %v3874_v51 = vadd.f32 %v2243_v20, %v3746_v33  ;;  %v3877_v9 = vadd.f32 %v2290_v41, %v3748_v37  ;;  %v3880_v10 = vadd.f32 %v2337_v7, %v3750_v60  ;;  %v3883_v22 = vadd.f32 %v2384_v56, %v3752_v13  ;;  %v1852_v13 = vpop.f32.mrf.mxu0  ;;  %v4237_v41 = vld [vmem:[#allocation19_spill] sm:$0xff]  ;;  %v4238_v7 = vld [vmem:[#allocation20_spill] sm:$0xff] }
 0x2e0   : > { %4228 = vst [vmem:[#allocation29_spill] sm:$0xff] %v3862_v30  ;;  %v1716_v23 = vadd.f32 %v3714_v32, %v1681_v44  ;;  %v1810_v37 = vadd.f32 %v1809_v14, %v3780_v45 }
 0x2e1   : > { %4229 = vst [vmem:[#allocation30_spill] sm:$0xff] %v3865_v8 }
 0x2e2   : > { %4230 = vst [vmem:[#allocation31_spill] sm:$0xff] %v3868_v59  ;;  %vm1992_vm3 = vcmp.lt.f32.partialorder %v1716_v23, 0.0  ;;  %v1848_v47 = vadd.f32 %v1847_v27, %v1810_v37  ;;  %v3939_v37 = vstv %s3888_s22  ;;  %s2556_s22 = sshll.u32 %s3125_s0, 8 }
 0x2e3   : > { %4231 = vst [vmem:[#allocation32_spill] sm:$0xff] %v3871_v50  ;;  %v2010_v33 = vsel %vm1992_vm3, %v3515_v1, %v3517_v62 }
 0x2e4   : > { %4232 = vst [vmem:[#allocation33_spill] sm:$0xff] %v3874_v51  ;;  %v2026_v32 = vmul.f32 %v2010_v33, %v1716_v23  ;;  %v4239_v23 = vld [vmem:[#allocation21_spill] sm:$0xff] }
 0x2e5   : > { %4233 = vst [vmem:[#allocation34_spill] sm:$0xff] %v3877_v9 }
 0x2e6   : > { %4234 = vst [vmem:[#allocation35_spill] sm:$0xff] %v3880_v10  ;;  %v3886_v29 = vpop.f32.mrf.mxu2  ;;  %v2052_v45 = vmul.f32 %v3758_v57, %v2026_v32  ;;  %v2099_v14 = vmul.f32 %v3760_v58, %v2026_v32  ;;  %v2146_v48 = vmul.f32 %v3764_v19, %v2026_v32  ;;  %v1893_v18 = vpop.f32.mrf.mxu1  ;;  %v2193_v44 = vmul.f32 %v3766_v12, %v2026_v32 }
 0x2e7   : > { %4235 = vst [vmem:[#allocation36_spill] sm:$0xff] %v3883_v22  ;;  %v1817_v16 = vpop.f32.mrf.mxu3  ;;  %v2240_v6 = vmul.f32 %v3768_v36, %v2026_v32  ;;  %v2287_v5 = vmul.f32 %v3770_v15, %v2026_v32  ;;  %v2334_v0 = vmul.f32 %v3772_v55, %v2026_v32  ;;  %v2381_v53 = vmul.f32 %v3774_v17, %v2026_v32  ;;  %v4236_v36 = vld [vmem:[#allocation18_spill] sm:$0xff] }
 0x2e8   : > { %v1888_v57 = vadd.f32 %v1887_v43, %v1848_v47  ;;  %v1814_v58 = vadd.f32 %v1813_v4, %v3813_v49  ;;  %v2056_v19 = vadd.f32 %v2052_v45, %v3613_v2  ;;  %v2103_v12 = vadd.f32 %v2099_v14, %v3615_v3  ;;  %v4240_v4 = vld [vmem:[#allocation22_spill] sm:$0xff]  ;;  %v4241_v43 = vld [vmem:[#allocation23_spill] sm:$0xff] }
 0x2e9   : > { %v2150_v15 = vadd.f32 %v2146_v48, %v4236_v36  ;;  %v2197_v17 = vadd.f32 %v2193_v44, %v4237_v41  ;;  %v2244_v56 = vadd.f32 %v2240_v6, %v4238_v7  ;;  %v2291_v49 = vadd.f32 %v2287_v5, %v4239_v23 }
 0x2ea   : > { %v2338_v27 = vadd.f32 %v2334_v0, %v4240_v4  ;;  %v2385_v3 = vadd.f32 %v2381_v53, %v4241_v43  ;;  %v3942_v32 = vstv %s3892_s21  ;;  %v1818_v47 = vadd.f32 %v1817_v16, %v3850_v40  ;;  %s2630_s21 = sshll.u32 %s3018_s9, 8 }
 0x2eb   : > { %v3946_v45 = vstv %s3890_s23  ;;  %v1853_v14 = vadd.f32 %v1852_v13, %v1814_v58  ;;  %v3949_v48 = vstv %s3901_s10  ;;  %v3952_v44 = vstv %s3896_s26  ;;  %s4005_s23 = scalar_lea.vmem [#allocation12], %s2556_s22 }
 0x2ec   : > { %v3955_v6 = vstv %s3903_s13  ;;  %v3960_v0 = vstv %s3899_s11  ;;  %v3963_v40 = vstv %s3907_s14  ;;  %v3966_v16 = vstv %s3909_s2  ;;  %s2422_s11 = scalar_lea.hbm %s4198_s8, %s2630_s21  ;;  %s2423_s10 = sshll.u32 %s4005_s23, 4  ;;  %s2424_s10 = int_to_ptr.vmem [resolvable:$true] %s2423_s10 }
 0x2ed   : > { %v3971_v53 = vstv %s3916_s17  ;;  %v3977_v58 = vstv %s3925_s18  ;;  %v3985_v41 = vstv %s3928_s1  ;;  %v1894_v7 = vadd.f32 %v1893_v18, %v1853_v14  ;;  %s2425_s13 = sshll.u32 %s2422_s11, 4  ;;  %s2411_s14 = scalar_lea.sflag [#allocation4], %s3125_s0  ;;  %s2426_s13 = int_to_ptr.hbm [resolvable:$true] %s2425_s13 }
 0x2ee   : > { %v1932_v60 = vpop.f32.mrf.mxu2  ;;  %v1899_v36 = vpop.f32.mrf.mxu1  ;;  %s2876_s2 = sshra.s32 %s2426_s13, 4  ;;  %s2882_s18 = scalar_lea.hbm %s4198_s8, 512  ;;  %s2877_s2 = int_to_ptr.hbm [resolvable:$true] %s2876_s2 }
 0x2ef   : > { %v3905_v21 = vpop.f32.mrf.mxu3  ;;  %v1933_v55 = vadd.f32 %v1932_v60, %v1888_v57  ;;  %v1857_v60 = vpop.f32.mrf.mxu0  ;;  %v3974_v57 = vstv %s3922_s20  ;;  %p2883_p9 = scmp.lt.s32.totalorder %s2877_s2, %s4198_s8 }
 0x2f0   : > { %v1858_v23 = vadd.f32 %v1857_v60, %v1818_v47  ;;  %v1822_v59 = vadd.f32 %v3905_v21, %v3886_v29  ;;  %v4011_v29 = vstv %s3979_s15 }
 0x2f6   : > { %v1936_v20 = vpop.f32.mrf.mxu2 }
 0x2f7   : > { %v1967_v2 = vpop.f32.mrf.mxu3  ;;  %v1937_v54 = vadd.f32 %v1936_v20, %v1894_v7  ;;  %v1862_v39 = vpop.f32.mrf.mxu0 }
 0x2f8   : > { %v1968_v33 = vadd.f32 %v1967_v2, %v1933_v55  ;;  %v3982_v55 = vstv %s3911_s3  ;;  %v1863_v20 = vadd.f32 %v1862_v39, %v1822_v59  ;;  %s2878_s3 = scalar_lea.hbm %s2877_s2, 256 }
 0x2f9   : > { %p2879_p1 = scmp.ne.s32.totalorder %s2877_s2, %s2878_s3  ;;  %p2884_p10 = scmp.lt.s32.totalorder %s2882_s18, %s2878_s3 }
 0x2fa   : > { %vm1996_vm5 = vcmp.lt.f32.partialorder %v1968_v33, 0.0 }
 0x2fb   : > { %v2014_v5 = vsel %vm1996_vm5, %v3515_v1, %v3517_v62  ;;  %p2880_p4 = pnand %p2879_p1, %p3087_p5  ;;  %p2885_p2 = por %p2884_p10, %p2883_p9 }
 0x2fc   : > { %v2030_v13 = vmul.f32 %v2014_v5, %v1968_v33 }
 0x2fd   : > { %p2881_p8 = pneg %p2880_p4 }
 0x2fe   : > { %v2062_v4 = vmul.f32 %v3939_v37, %v2030_v13  ;;  %v2109_v2 = vmul.f32 %v3946_v45, %v2030_v13  ;;  %v2156_v43 = vmul.f32 %v3952_v44, %v2030_v13  ;;  %v2203_v33 = vmul.f32 %v3960_v0, %v2030_v13  ;;  %v1940_v50 = vpop.f32.mrf.mxu2 }
 0x2ff   : > { %v2250_v5 = vmul.f32 %v3966_v16, %v2030_v13  ;;  %v2297_v22 = vmul.f32 %v3971_v53, %v2030_v13  ;;  %v2344_v10 = vmul.f32 %v3974_v57, %v2030_v13  ;;  %v2391_v9 = vmul.f32 %v3977_v58, %v2030_v13  ;;  %v1971_v51 = vpop.f32.mrf.mxu3  ;;  %p2886_p11 = pnand %p2885_p2, %p2881_p8 }
 0x300   : > { %v2066_v18 = vadd.f32 %v2062_v4, %v2056_v19  ;;  %v2113_v60 = vadd.f32 %v2109_v2, %v2103_v12  ;;  %v2160_v47 = vadd.f32 %v2156_v43, %v2150_v15  ;;  %v2207_v14 = vadd.f32 %v2203_v33, %v2197_v17 }
 0x301   : > { %v2254_v8 = vadd.f32 %v2250_v5, %v2244_v56  ;;  %v2301_v30 = vadd.f32 %v2297_v22, %v2291_v49  ;;  %v2348_v11 = vadd.f32 %v2344_v10, %v2338_v27  ;;  %v4003_v12 = vstv %s3968_s16 }
 0x302   : > { %v2072_v42 = vadd.f32 %v3942_v32, %v2066_v18  ;;  %v2119_v63 = vadd.f32 %v3949_v48, %v2113_v60  ;;  %v2166_v13 = vadd.f32 %v3955_v6, %v2160_v47  ;;  %v2213_v19 = vadd.f32 %v3963_v40, %v2207_v14 }
 0x303   : > { %v2395_v15 = vadd.f32 %v2391_v9, %v2385_v3  ;;  %v2260_v22 = vadd.f32 %v3982_v55, %v2254_v8  ;;  %v1972_v10 = vadd.f32 %v1971_v51, %v1937_v54  ;;  %v2307_v21 = vadd.f32 %v3985_v41, %v2301_v30 }
 0x304   : > { %2077 = vst.msk [vmem:[%s4005_s23] sm:$0xff] %vm2076_vm4, %v2072_v42  ;;  %v1900_v9 = vadd.f32 %v1899_v36, %v1858_v23  ;;  %v2354_v17 = vadd.f32 %v4003_v12, %v2348_v11  ;;  %v1905_v42 = vpop.f32.mrf.mxu1 }
 0x305   : > { %2566 = vst.msk [vmem:[%s4005_s23 + $0x20] sm:$0xff] %vm2076_vm4, %v2119_v63  ;;  %vm1997_vm6 = vcmp.lt.f32.partialorder %v1972_v10, 0.0  ;;  %v2401_v8 = vadd.f32 %v4011_v29, %v2395_v15  ;;  %v1906_v59 = vadd.f32 %v1905_v42, %v1863_v20 }
 0x306   : > { %2575 = vst.msk [vmem:[%s4005_s23 + $0x40] sm:$0xff] %vm2076_vm4, %v2166_v13  ;;  %v2015_v54 = vsel %vm1997_vm6, %v3515_v1, %v3517_v62  ;;  %v1941_v63 = vadd.f32 %v1940_v50, %v1900_v9  ;;  %v1944_v3 = vpop.f32.mrf.mxu2 }
 0x307   : > { %2584 = vst.msk [vmem:[%s4005_s23 + $0x60] sm:$0xff] %vm2076_vm4, %v2213_v19  ;;  %v1975_v51 = vpop.f32.mrf.mxu3  ;;  %v2031_v30 = vmul.f32 %v2015_v54, %v1972_v10  ;;  %v1945_v60 = vadd.f32 %v1944_v3, %v1906_v59  ;;  %v4243_v59 = vld [vmem:[#allocation25_spill] sm:$0xff] }
 0x308   : > { %2593 = vst.msk [vmem:[%s4005_s23 + $0x80] sm:$0xff] %vm2076_vm4, %v2260_v22  ;;  %v1976_v39 = vadd.f32 %v1975_v51, %v1941_v63 }
 0x309   : > { %2602 = vst.msk [vmem:[%s4005_s23 + $0xa0] sm:$0xff] %vm2076_vm4, %v2307_v21  ;;  %v2063_v11 = vmul.f32 %v3939_v37, %v2031_v30  ;;  %v2110_v56 = vmul.f32 %v3946_v45, %v2031_v30  ;;  %v2157_v49 = vmul.f32 %v3952_v44, %v2031_v30  ;;  %v2204_v27 = vmul.f32 %v3960_v0, %v2031_v30 }
 0x30a   : > { %2611 = vst.msk [vmem:[%s4005_s23 + $0xc0] sm:$0xff] %vm2076_vm4, %v2354_v17  ;;  %v2251_v50 = vmul.f32 %v3966_v16, %v2031_v30  ;;  %v2298_v36 = vmul.f32 %v3971_v53, %v2031_v30  ;;  %v2345_v7 = vmul.f32 %v3974_v57, %v2031_v30  ;;  %v2392_v23 = vmul.f32 %v3977_v58, %v2031_v30  ;;  %v4242_v30 = vld [vmem:[#allocation24_spill] sm:$0xff] }
 0x30b   : > { %2620 = vst.msk [vmem:[%s4005_s23 + $0xe0] sm:$0xff] %vm2076_vm4, %v2401_v8  ;;  %v2067_v4 = vadd.f32 %v2063_v11, %v3787_v52  ;;  %v2114_v2 = vadd.f32 %v2110_v56, %v3790_v38  ;;  %v2161_v43 = vadd.f32 %v2157_v49, %v3793_v34  ;;  %v2208_v33 = vadd.f32 %v2204_v27, %v3796_v28  ;;  %v4244_v56 = vld [vmem:[#allocation26_spill] sm:$0xff]  ;;  %v4245_v27 = vld [vmem:[#allocation27_spill] sm:$0xff] }
 0x30c   : > { %v2255_v5 = vadd.f32 %v2251_v50, %v3799_v31  ;;  %v2302_v18 = vadd.f32 %v2298_v36, %v3802_v26  ;;  %v2349_v52 = vadd.f32 %v2345_v7, %v3805_v25  ;;  %v2396_v34 = vadd.f32 %v2392_v23, %v3808_v61  ;;  %v4246_v50 = vld [vmem:[#allocation28_spill] sm:$0xff] }
 0x30d   : > { %v2073_v47 = vadd.f32 %v3942_v32, %v2067_v4  ;;  %v2120_v14 = vadd.f32 %v3949_v48, %v2114_v2  ;;  %v2167_v13 = vadd.f32 %v3955_v6, %v2161_v43  ;;  %v2214_v38 = vadd.f32 %v3963_v40, %v2208_v33 }
 0x30e   : > { %v2261_v31 = vadd.f32 %v3982_v55, %v2255_v5  ;;  %vm1998_vm7 = vcmp.lt.f32.partialorder %v1976_v39, 0.0  ;;  %v2308_v19 = vadd.f32 %v3985_v41, %v2302_v18  ;;  %v2355_v61 = vadd.f32 %v4003_v12, %v2349_v52 }
 0x30f   : > { %v1979_v28 = vpop.f32.mrf.mxu3  ;;  %2078 = vst.msk [vmem:[%s4005_s23 + $0x8] sm:$0xff] %vm2076_vm4, %v2073_v47  ;;  %v2016_v25 = vsel %vm1998_vm7, %v3515_v1, %v3517_v62  ;;  %v2402_v22 = vadd.f32 %v4011_v29, %v2396_v34 }
 0x310   : > { %v1980_v26 = vadd.f32 %v1979_v28, %v1945_v60  ;;  %2567 = vst.msk [vmem:[%s4005_s23 + $0x28] sm:$0xff] %vm2076_vm4, %v2120_v14  ;;  %v2032_v15 = vmul.f32 %v2016_v25, %v1976_v39 }
 0x311   : > { %2576 = vst.msk [vmem:[%s4005_s23 + $0x48] sm:$0xff] %vm2076_vm4, %v2167_v13 }
 0x312   : > { %vm1999_vm8 = vcmp.lt.f32.partialorder %v1980_v26, 0.0  ;;  %2585 = vst.msk [vmem:[%s4005_s23 + $0x68] sm:$0xff] %vm2076_vm4, %v2214_v38  ;;  %v2064_v21 = vmul.f32 %v3939_v37, %v2032_v15  ;;  %v2111_v9 = vmul.f32 %v3946_v45, %v2032_v15  ;;  %v2158_v20 = vmul.f32 %v3952_v44, %v2032_v15 }
 0x313   : > { %v2017_v10 = vsel %vm1999_vm8, %v3515_v1, %v3517_v62  ;;  %2594 = vst.msk [vmem:[%s4005_s23 + $0x88] sm:$0xff] %vm2076_vm4, %v2261_v31  ;;  %v2205_v17 = vmul.f32 %v3960_v0, %v2032_v15  ;;  %v2252_v42 = vmul.f32 %v3966_v16, %v2032_v15  ;;  %v2299_v8 = vmul.f32 %v3971_v53, %v2032_v15  ;;  %v4250_v31 = vld [vmem:[#allocation32_spill] sm:$0xff] }
 0x314   : > { %2603 = vst.msk [vmem:[%s4005_s23 + $0xa8] sm:$0xff] %vm2076_vm4, %v2308_v19  ;;  %v2346_v54 = vmul.f32 %v3974_v57, %v2032_v15  ;;  %v2393_v1 = vmul.f32 %v3977_v58, %v2032_v15  ;;  %v2068_v62 = vadd.f32 %v2064_v21, %v3825_v24  ;;  %v2115_v63 = vadd.f32 %v2111_v9, %v3828_v35  ;;  %v4253_v15 = vld [vmem:[#allocation35_spill] sm:$0xff]  ;;  %v4254_v21 = vld [vmem:[#allocation36_spill] sm:$0xff] }
 0x315   : > { %2612 = vst.msk [vmem:[%s4005_s23 + $0xc8] sm:$0xff] %vm2076_vm4, %v2355_v61  ;;  %v2162_v51 = vadd.f32 %v2158_v20, %v3831_v46  ;;  %v2209_v39 = vadd.f32 %v2205_v17, %v4242_v30  ;;  %v2256_v11 = vadd.f32 %v2252_v42, %v4243_v59  ;;  %v2303_v49 = vadd.f32 %v2299_v8, %v4244_v56 }
 0x316   : > { %2621 = vst.msk [vmem:[%s4005_s23 + $0xe8] sm:$0xff] %vm2076_vm4, %v2402_v22  ;;  %v2350_v3 = vadd.f32 %v2346_v54, %v4245_v27  ;;  %v2397_v36 = vadd.f32 %v2393_v1, %v4246_v50  ;;  %v2074_v24 = vadd.f32 %v3942_v32, %v2068_v62  ;;  %v2121_v35 = vadd.f32 %v3949_v48, %v2115_v63 }
 0x317   : > { %v2168_v46 = vadd.f32 %v3955_v6, %v2162_v51  ;;  %v2215_v7 = vadd.f32 %v3963_v40, %v2209_v39  ;;  %v2262_v23 = vadd.f32 %v3982_v55, %v2256_v11  ;;  %v2033_v4 = vmul.f32 %v2017_v10, %v1980_v26 }
 0x318   : > { %2079 = vst.msk [vmem:[%s4005_s23 + $0x10] sm:$0xff] %vm2076_vm4, %v2074_v24  ;;  %v2309_v2 = vadd.f32 %v3985_v41, %v2303_v49  ;;  %v2356_v43 = vadd.f32 %v4003_v12, %v2350_v3  ;;  %v2403_v33 = vadd.f32 %v4011_v29, %v2397_v36 }
 0x319   : > { %2568 = vst.msk [vmem:[%s4005_s23 + $0x30] sm:$0xff] %vm2076_vm4, %v2121_v35  ;;  %v2065_v5 = vmul.f32 %v3939_v37, %v2033_v4  ;;  %v2112_v18 = vmul.f32 %v3946_v45, %v2033_v4  ;;  %v2159_v60 = vmul.f32 %v3952_v44, %v2033_v4  ;;  %v2206_v47 = vmul.f32 %v3960_v0, %v2033_v4  ;;  %v4247_v37 = vld [vmem:[#allocation29_spill] sm:$0xff]  ;;  %v4248_v44 = vld [vmem:[#allocation30_spill] sm:$0xff]  ;;  %v4249_v0 = vld [vmem:[#allocation31_spill] sm:$0xff] }
 0x31a   : > { %2577 = vst.msk [vmem:[%s4005_s23 + $0x50] sm:$0xff] %vm2076_vm4, %v2168_v46  ;;  %v2253_v14 = vmul.f32 %v3966_v16, %v2033_v4  ;;  %v2300_v13 = vmul.f32 %v3971_v53, %v2033_v4  ;;  %v2347_v52 = vmul.f32 %v3974_v57, %v2033_v4  ;;  %v2394_v38 = vmul.f32 %v3977_v58, %v2033_v4  ;;  %v4251_v53 = vld [vmem:[#allocation33_spill] sm:$0xff]  ;;  %v4252_v58 = vld [vmem:[#allocation34_spill] sm:$0xff] }
 0x31b   : > { %2586 = vst.msk [vmem:[%s4005_s23 + $0x70] sm:$0xff] %vm2076_vm4, %v2215_v7  ;;  %v2069_v45 = vadd.f32 %v2065_v5, %v4247_v37  ;;  %v2116_v34 = vadd.f32 %v2112_v18, %v4248_v44  ;;  %v2163_v28 = vadd.f32 %v2159_v60, %v4249_v0  ;;  %v2210_v16 = vadd.f32 %v2206_v47, %v4250_v31 }
 0x31c   : > { %2595 = vst.msk [vmem:[%s4005_s23 + $0x90] sm:$0xff] %vm2076_vm4, %v2262_v23  ;;  %v2257_v57 = vadd.f32 %v2253_v14, %v4251_v53  ;;  %v2304_v26 = vadd.f32 %v2300_v13, %v4252_v58  ;;  %v2351_v22 = vadd.f32 %v2347_v52, %v4253_v15 }
 0x31d   : > { %2604 = vst.msk [vmem:[%s4005_s23 + $0xb0] sm:$0xff] %vm2076_vm4, %v2309_v2  ;;  %v2075_v19 = vadd.f32 %v3942_v32, %v2069_v45  ;;  %v2122_v25 = vadd.f32 %v3949_v48, %v2116_v34  ;;  %v2169_v61 = vadd.f32 %v3955_v6, %v2163_v28  ;;  %v2216_v10 = vadd.f32 %v3963_v40, %v2210_v16 }
 0x31e   : > { %2613 = vst.msk [vmem:[%s4005_s23 + $0xd0] sm:$0xff] %vm2076_vm4, %v2356_v43  ;;  %v2398_v32 = vadd.f32 %v2394_v38, %v4254_v21  ;;  %v2263_v48 = vadd.f32 %v3982_v55, %v2257_v57  ;;  %v2310_v6 = vadd.f32 %v3985_v41, %v2304_v26  ;;  %v2357_v40 = vadd.f32 %v4003_v12, %v2351_v22 }
 0x31f   : > { %2622 = vst.msk [vmem:[%s4005_s23 + $0xf0] sm:$0xff] %vm2076_vm4, %v2403_v33 }
 0x320   : > { %2080 = vst.msk [vmem:[%s4005_s23 + $0x18] sm:$0xff] %vm2076_vm4, %v2075_v19  ;;  %v2404_v9 = vadd.f32 %v4011_v29, %v2398_v32 }
 0x321   : > { %2569 = vst.msk [vmem:[%s4005_s23 + $0x38] sm:$0xff] %vm2076_vm4, %v2122_v25 }
 0x322   : > { %2578 = vst.msk [vmem:[%s4005_s23 + $0x58] sm:$0xff] %vm2076_vm4, %v2169_v61 }
 0x323   : > { %2587 = vst.msk [vmem:[%s4005_s23 + $0x78] sm:$0xff] %vm2076_vm4, %v2216_v10 }
 0x324   : > { %2596 = vst.msk [vmem:[%s4005_s23 + $0x98] sm:$0xff] %vm2076_vm4, %v2263_v48 }
 0x325   : > { %2605 = vst.msk [vmem:[%s4005_s23 + $0xb8] sm:$0xff] %vm2076_vm4, %v2310_v6 }
 0x326   : > { %2614 = vst.msk [vmem:[%s4005_s23 + $0xd8] sm:$0xff] %vm2076_vm4, %v2357_v40 }
 0x327   : > { %2623 = vst.msk [vmem:[%s4005_s23 + $0xf8] sm:$0xff] %vm2076_vm4, %v2404_v9 }
 0x328   : > { %2889 = shalt.err (!%p2886_p11)
}
 0x329   : > { %s2950_s0 = smov 128   ;;  %s2951_s15 = smov 8  }
 0x32a   : > { %2649 = dma.vmem_to_hbm [thread:$0]  (%p3087_p5), %s2424_s10, 4096, %s2426_s13, %s2411_s14, %s2950_s0, %s2950_s0, %s2951_s15  }
 0x32b PF: > { %s2440_s22 = sand.u32 1, %s2928_s27   ;;  %p4255_p12 = scmp.ge.s32.totalorder %s2940_s30, 2 }
 0x32c   : > { %s2441_s23 = scalar_lea.sflag [#allocation4], %s2440_s22 }
 0x32d   : > { %p2669_p13 = pnand %p4255_p12, %p3032_p6 }
 0x32f   : > { %p2670_p0 = pneg %p2669_p13 }
 0x331   : > { %2923 = dma.done.wait (%p2670_p0), %s2441_s23, 4096  }
 0x332   : > { %2925 = vsyncadd (%p2670_p0), %s2441_s23, 4294963200  ;;  %p24_p3 = scmp.ge.s32.totalorder %s3074_s19, 4   ;;  %s4256_s27 = smov %s2932_s28 }
 0x333   : > { %s4257_s28 = smov %s2936_s29  ;;  %s4258_s29 = smov %s3083_s24 }
 0x334   : > { %s4259_s30 = smov %s3074_s19  ;;  %26 = sbr.rel (!%p24_p3) target bundleno = 13 (0xd), region = 121 }
 0x339   :  { %2447 = vsyncpa [#allocation3], 1 }
 0x33a   :  { %2449 = vsyncpa [#allocation3 + $0x1], 1 }
 0x33b   :  { %2450 = vsyncpa [#allocation11], 1 }
 0x33c   :  { %2451 = vsyncpa [#allocation4], 1 }
 0x33d   :  { %2453 = vsyncpa [#allocation4 + $0x1], 1 }
 0x33e   :  { %2454 = vsyncpa [#allocation5], 1 }
 0x33f   :  { %2456 = vsyncpa [#allocation5 + $0x1], 1 }
 0x340   :  { %2457 = vsyncpa [#allocation7], 1 }

</bundles_post_ra>
